<compile_context>
chip_gen: v6e
topology: v6e:2x2x1
jax: 0.10.0
libtpu: 0.0.40
codegen_flags: <defaults>
</compile_context>

<pallas_src>
import jax
import jax.numpy as jnp
from jax.experimental import pallas as pl
from jax.experimental.pallas import tpu as pltpu

MAX_ENTITIES = 100
ENTITY_FEAT_DIM = 26
MISSION_DIM = 7
ACTION_DIM_PARAM = 10
ENT_IN = MAX_ENTITIES * ENTITY_FEAT_DIM            # 2600
ENT_HID = 256
SMALL_HID = 64
SMALL_IN = MAX_ENTITIES + 2 * MAX_ENTITIES + MISSION_DIM   # ctl(100)+vis(200)+mis(7)=307
SMALL_OUT = 3 * SMALL_HID                           # 192  -> [ctl | vis | mis]
COMBINED_OUT = 256
NUM_LOGITS = 4
LS_START = NUM_LOGITS + ACTION_DIM_PARAM            # 14
OUT_DIM = NUM_LOGITS + 2 * ACTION_DIM_PARAM         # 24


def _relu(x):
    return jnp.maximum(x, 0.0)


def _round_up(x, m):
    return ((x + m - 1) // m) * m


# --------------------------------------------------------------------------- #
# Kernel
# --------------------------------------------------------------------------- #
def flag_frenzy_kernel(
    # data (per-batch-tile)
    ent_ref, small_ref, hv_ref,
    # weights / biases (resident, bf16 weights + f32 biases)
    w_ent_ref, b_ent_ref,
    w_small_ref, b_small_ref,
    w_comb_ent_ref, w_comb_small_ref, b_comb_ref,
    w_head_ref, b_head_ref,
    # output
    out_ref,
):
    f32 = jnp.float32
    bf16 = jnp.bfloat16

    # --- entity encoder: [TB, 2600] @ [2600, 256] (bf16 in, f32 acc) ---
    ent_enc = _relu(
        jnp.dot(ent_ref[...], w_ent_ref[...], preferred_element_type=f32)
        + b_ent_ref[...])

    # --- fused small encoders (block-diagonal): [TB, 307] @ [307, 192] ---
    # output lanes: [ctl_enc(0:64) | vis_enc(64:128) | mis_enc(128:192)]
    small_enc = _relu(
        jnp.dot(small_ref[...], w_small_ref[...], preferred_element_type=f32)
        + b_small_ref[...])

    # --- combined_fc as two partial matmuls (rows of W_comb re-ordered at init
    #     to match [ctl|vis|mis] lane order); mathematically identical to
    #     concat([ctl, ent, vis, mis]) @ W_comb + b ---
    comb = (
        jnp.dot(ent_enc.astype(bf16), w_comb_ent_ref[...], preferred_element_type=f32)
        + jnp.dot(small_enc.astype(bf16), w_comb_small_ref[...], preferred_element_type=f32)
        + b_comb_ref[...])
    features = _relu(comb)

    # --- fused heads: [TB, 256] @ [256, 24] -> [logits(0:4) | mu(4:14) | log_std(14:24)] ---
    head = (jnp.dot(features.astype(bf16), w_head_ref[...], preferred_element_type=f32)
            + b_head_ref[...])

    col = jax.lax.broadcasted_iota(jnp.int32, head.shape, 1)          # [TB, 24]

    # std = exp(clip(log_std, -5, 2)) on lanes 14..23 only
    std_vals = jnp.exp(jnp.clip(head, -5.0, 2.0))
    head = jnp.where(col >= LS_START, std_vals, head)

    # engage-mask gating of logits[:, 3]
    has_valid = hv_ref[...] > 0.5                                     # [TB, 1]
    head = jnp.where(
        jnp.logical_and(col == NUM_LOGITS - 1, jnp.logical_not(has_valid)),
        jnp.float32(-1e9),
        head)

    # single full-tile store [TB, 24]
    out_ref[...] = head


# --------------------------------------------------------------------------- #
# Parameters
# --------------------------------------------------------------------------- #
def init_params(key):
    """PyTorch-default-style uniform init (f32), deterministic from `key`."""
    def linear(k, fan_in, fan_out):
        k1, k2 = jax.random.split(k)
        bound = 1.0 / (fan_in ** 0.5)
        w = jax.random.uniform(k1, (fan_in, fan_out), jnp.float32, -bound, bound)
        b = jax.random.uniform(k2, (1, fan_out), jnp.float32, -bound, bound)
        return w, b

    keys = jax.random.split(key, 8)
    p = {}
    p["w_ent"], p["b_ent"] = linear(keys[0], ENT_IN, ENT_HID)
    p["w_vis"], p["b_vis"] = linear(keys[1], MAX_ENTITIES * 2, SMALL_HID)
    p["w_mis"], p["b_mis"] = linear(keys[2], MISSION_DIM, SMALL_HID)
    p["w_ctl"], p["b_ctl"] = linear(keys[3], MAX_ENTITIES, SMALL_HID)
    p["w_comb"], p["b_comb"] = linear(keys[4], SMALL_HID + ENT_HID + 2 * SMALL_HID, COMBINED_OUT)
    p["w_act"], p["b_act"] = linear(keys[5], COMBINED_OUT, NUM_LOGITS)
    p["w_mu"], p["b_mu"] = linear(keys[6], COMBINED_OUT, ACTION_DIM_PARAM)
    p["w_ls"], p["b_ls"] = linear(keys[7], COMBINED_OUT, ACTION_DIM_PARAM)
    # TODO(synk): _value_branch (Linear(256,1)) is not part of forward(); omitted here.
    return p


def prepare_params(p):
    """Build the fused, bf16 kernel parameters once (not per call)."""
    f32, bf16 = jnp.float32, jnp.bfloat16

    # Fused small-encoder block-diagonal weight [307, 192], input order
    # [ctl(100) | vis(200) | mis(7)], output order [ctl(64) | vis(64) | mis(64)].
    w_small = jnp.zeros((SMALL_IN, SMALL_OUT), f32)
    w_small = w_small.at[0:100, 0:64].set(p["w_ctl"])
    w_small = w_small.at[100:300, 64:128].set(p["w_vis"])
    w_small = w_small.at[300:307, 128:192].set(p["w_mis"])
    b_small = jnp.concatenate([p["b_ctl"], p["b_vis"], p["b_mis"]], axis=1)   # [1, 192]

    # combined_fc: original row order is [ctl(0:64), ent(64:320), vis(320:384), mis(384:448)].
    w_comb_ent = p["w_comb"][64:320, :]                                        # [256, 256]
    w_comb_small = jnp.concatenate(                                            # [192, 256]
        [p["w_comb"][0:64, :], p["w_comb"][320:384, :], p["w_comb"][384:448, :]], axis=0)

    # Fused heads: [256, 24] = [act(4) | mu(10) | log_std(10)] along the output axis.
    w_head = jnp.concatenate([p["w_act"], p["w_mu"], p["w_ls"]], axis=1)
    b_head = jnp.concatenate([p["b_act"], p["b_mu"], p["b_ls"]], axis=1)

    return {
        "w_ent": p["w_ent"].astype(bf16), "b_ent": p["b_ent"].astype(f32),
        "w_small": w_small.astype(bf16), "b_small": b_small.astype(f32),
        "w_comb_ent": w_comb_ent.astype(bf16),
        "w_comb_small": w_comb_small.astype(bf16),
        "b_comb": p["b_comb"].astype(f32),
        "w_head": w_head.astype(bf16), "b_head": b_head.astype(f32),
    }


# --------------------------------------------------------------------------- #
# Wrapper
# --------------------------------------------------------------------------- #
def flag_frenzy_forward(entities, legacy, dynasty, mission, controllable,
                        engage_mask, kparams):
    B = entities.shape[0]
    bf16 = jnp.bfloat16

    # Glue (plain JAX): flatten / concat / has_valid flag, cast to bf16.
    ent_flat = entities.reshape(B, ENT_IN).astype(bf16)
    small_in = jnp.concatenate(
        [controllable.astype(jnp.float32),
         legacy.astype(jnp.float32),
         dynasty.astype(jnp.float32),
         mission.astype(jnp.float32)], axis=-1).astype(bf16)                  # [B, 307]
    has_valid = jnp.any(engage_mask.reshape(B, -1) > 0.5, axis=1,
                        keepdims=True).astype(jnp.float32)                    # [B, 1]

    # Batch tiling: tile size TB (multiple of 16), pad batch to a multiple of TB.
    TB = 256
    if B <= TB:
        TB = _round_up(max(B, 1), 16)
    padded_B = _round_up(B, TB)
    if padded_B != B:
        pad = ((0, padded_B - B), (0, 0))
        ent_flat = jnp.pad(ent_flat, pad)
        small_in = jnp.pad(small_in, pad)
        has_valid = jnp.pad(has_valid, pad)
    n_tiles = padded_B // TB

    inputs = (
        ent_flat, small_in, has_valid,
        kparams["w_ent"], kparams["b_ent"],
        kparams["w_small"], kparams["b_small"],
        kparams["w_comb_ent"], kparams["w_comb_small"], kparams["b_comb"],
        kparams["w_head"], kparams["b_head"],
    )

    def batch_spec(x):
        return pl.BlockSpec((TB,) + x.shape[1:], lambda i: (i, 0))

    def resident_spec(x):
        nd = x.ndim
        return pl.BlockSpec(x.shape, lambda i, _nd=nd: (0,) * _nd)

    in_specs = [batch_spec(ent_flat), batch_spec(small_in), batch_spec(has_valid)]
    in_specs += [resident_spec(x) for x in inputs[3:]]

    out = pl.pallas_call(
        flag_frenzy_kernel,
        out_shape=jax.ShapeDtypeStruct((padded_B, OUT_DIM), jnp.float32),
        grid=(n_tiles,),
        in_specs=in_specs,
        out_specs=pl.BlockSpec((TB, OUT_DIM), lambda i: (i, 0)),
        compiler_params=pltpu.CompilerParams(
            dimension_semantics=("parallel",),      # shards batch tiles across TCs on v7x
            vmem_limit_bytes=32 << 20,
        ),
    )(*inputs)
    return out[:B]


# --------------------------------------------------------------------------- #
# Pure-JAX reference (original module semantics) for a correctness check.
# Weights/inputs are round-tripped through bf16 so only the kernel's
# intermediate-activation rounding differs.
# --------------------------------------------------------------------------- #
def _reference_forward(entities, legacy, dynasty, mission, controllable, engage_mask, p):
    def q(x):
        return x.astype(jnp.bfloat16).astype(jnp.float32)

    B = entities.shape[0]
    ent = jnp.maximum(q(entities.reshape(B, -1)) @ q(p["w_ent"]) + p["b_ent"], 0.0)
    vis = jnp.maximum(q(jnp.concatenate([legacy, dynasty], -1)) @ q(p["w_vis"]) + p["b_vis"], 0.0)
    mis = jnp.maximum(q(mission) @ q(p["w_mis"]) + p["b_mis"], 0.0)
    ctl = jnp.maximum(q(controllable) @ q(p["w_ctl"]) + p["b_ctl"], 0.0)
    x = jnp.concatenate([ctl, ent, vis, mis], -1)
    feats = jnp.maximum(x @ q(p["w_comb"]) + p["b_comb"], 0.0)
    logits = feats @ q(p["w_act"]) + p["b_act"]
    mu = feats @ q(p["w_mu"]) + p["b_mu"]
    log_std = jnp.clip(feats @ q(p["w_ls"]) + p["b_ls"], -5.0, 2.0)
    std = jnp.exp(log_std)
    has_valid = jnp.any(engage_mask.reshape(B, -1) > 0.5, axis=1)
    logits = logits.at[:, 3].set(jnp.where(has_valid, logits[:, 3], -1e9))
    return jnp.concatenate([logits, mu, std], axis=1)


if __name__ == "__main__":
    key = jax.random.PRNGKey(0)
    k_params, k_ent, k_leg, k_dyn, k_mis, k_ctl = jax.random.split(key, 6)

    B = 2
    params = init_params(k_params)
    kparams = prepare_params(params)

    entities = jax.random.normal(k_ent, (B, MAX_ENTITIES, ENTITY_FEAT_DIM), jnp.float32)
    legacy = jax.random.uniform(k_leg, (B, MAX_ENTITIES), jnp.float32)
    dynasty = jax.random.uniform(k_dyn, (B, MAX_ENTITIES), jnp.float32)
    mission = jax.random.normal(k_mis, (B, MISSION_DIM), jnp.float32)
    controllable = jax.random.uniform(k_ctl, (B, MAX_ENTITIES), jnp.float32)
    # batch 0 has valid engage targets, batch 1 does not (exercises the logit masking)
    engage_mask = jnp.zeros((B, MAX_ENTITIES), jnp.float32).at[0, 5].set(1.0)

    out = flag_frenzy_forward(entities, legacy, dynasty, mission,
                              controllable, engage_mask, kparams)
    out = jax.block_until_ready(out)

    ref = _reference_forward(entities, legacy, dynasty, mission,
                             controllable, engage_mask, params)
    assert out.shape == (B, OUT_DIM)
    assert bool(jnp.allclose(out, ref, atol=3e-2, rtol=3e-2)), "mismatch vs JAX reference"

    print("KERNEL_OK")
</pallas_src>

<mosaic_0001>
module attributes {stable_mosaic.version = 11 : i64} {
  func.func @flag_frenzy_kernel(%arg0: i32, %arg1: memref<16x2600xbf16, #tpu.memory_space<vmem>>, %arg2: memref<16x307xbf16, #tpu.memory_space<vmem>>, %arg3: memref<16x1xf32, #tpu.memory_space<vmem>>, %arg4: memref<2600x256xbf16, #tpu.memory_space<vmem>>, %arg5: memref<1x256xf32, #tpu.memory_space<vmem>>, %arg6: memref<307x192xbf16, #tpu.memory_space<vmem>>, %arg7: memref<1x192xf32, #tpu.memory_space<vmem>>, %arg8: memref<256x256xbf16, #tpu.memory_space<vmem>>, %arg9: memref<192x256xbf16, #tpu.memory_space<vmem>>, %arg10: memref<1x256xf32, #tpu.memory_space<vmem>>, %arg11: memref<256x24xbf16, #tpu.memory_space<vmem>>, %arg12: memref<1x24xf32, #tpu.memory_space<vmem>>, %arg13: memref<16x24xf32, #tpu.memory_space<vmem>>) attributes {dimension_semantics = [#tpu.dimension_semantics<parallel>], iteration_bounds = array<i64: 1>, scalar_prefetch = 0 : i64, scratch_operands = 0 : i64, tpu.core_type = #tpu.core_type<tc>, window_params = [{transform_indices = @transform_0, window_bounds = array<i64: 16, 2600>}, {transform_indices = @transform_1, window_bounds = array<i64: 16, 307>}, {transform_indices = @transform_2, window_bounds = array<i64: 16, 1>}, {pipeline_mode = #tpu.pipeline_mode<synchronous>, transform_indices = @transform_3, window_bounds = array<i64: 2600, 256>}, {pipeline_mode = #tpu.pipeline_mode<synchronous>, transform_indices = @transform_4, window_bounds = array<i64: 1, 256>}, {pipeline_mode = #tpu.pipeline_mode<synchronous>, transform_indices = @transform_5, window_bounds = array<i64: 307, 192>}, {pipeline_mode = #tpu.pipeline_mode<synchronous>, transform_indices = @transform_6, window_bounds = array<i64: 1, 192>}, {pipeline_mode = #tpu.pipeline_mode<synchronous>, transform_indices = @transform_7, window_bounds = array<i64: 256, 256>}, {pipeline_mode = #tpu.pipeline_mode<synchronous>, transform_indices = @transform_8, window_bounds = array<i64: 192, 256>}, {pipeline_mode = #tpu.pipeline_mode<synchronous>, transform_indices = @transform_9, window_bounds = array<i64: 1, 256>}, {pipeline_mode = #tpu.pipeline_mode<synchronous>, transform_indices = @transform_10, window_bounds = array<i64: 256, 24>}, {pipeline_mode = #tpu.pipeline_mode<synchronous>, transform_indices = @transform_11, window_bounds = array<i64: 1, 24>}, {transform_indices = @transform_12, window_bounds = array<i64: 16, 24>}]} {
    %c0 = arith.constant 0 : index
    %c0_0 = arith.constant 0 : index
    %0 = vector.load %arg1[%c0, %c0_0] : memref<16x2600xbf16, #tpu.memory_space<vmem>>, vector<16x2600xbf16>
    %c0_1 = arith.constant 0 : index
    %c0_2 = arith.constant 0 : index
    %1 = vector.load %arg4[%c0_1, %c0_2] : memref<2600x256xbf16, #tpu.memory_space<vmem>>, vector<2600x256xbf16>
    %cst = arith.constant dense<0.000000e+00> : vector<16x256xf32>
    %2 = tpu.matmul %0, %1, %cst {dimension_numbers = #tpu.dot_dimension_numbers<[1], [0], [0], [1], [0, 0, 1, 1], [], []>} : vector<16x2600xbf16>, vector<2600x256xbf16>, vector<16x256xf32> -> vector<16x256xf32>
    %c0_3 = arith.constant 0 : index
    %c0_4 = arith.constant 0 : index
    %3 = vector.load %arg5[%c0_3, %c0_4] : memref<1x256xf32, #tpu.memory_space<vmem>>, vector<1x256xf32>
    %4 = vector.broadcast %3 : vector<1x256xf32> to vector<16x256xf32>
    %5 = arith.addf %2, %4 : vector<16x256xf32>
    %cst_5 = arith.constant 0.000000e+00 : f32
    %6 = vector.broadcast %cst_5 : f32 to vector<16x256xf32>
    %7 = arith.maximumf %5, %6 : vector<16x256xf32>
    %c0_6 = arith.constant 0 : index
    %c0_7 = arith.constant 0 : index
    %8 = vector.load %arg2[%c0_6, %c0_7] : memref<16x307xbf16, #tpu.memory_space<vmem>>, vector<16x307xbf16>
    %c0_8 = arith.constant 0 : index
    %c0_9 = arith.constant 0 : index
    %9 = vector.load %arg6[%c0_8, %c0_9] : memref<307x192xbf16, #tpu.memory_space<vmem>>, vector<307x192xbf16>
    %cst_10 = arith.constant dense<0.000000e+00> : vector<16x192xf32>
    %10 = tpu.matmul %8, %9, %cst_10 {dimension_numbers = #tpu.dot_dimension_numbers<[1], [0], [0], [1], [0, 0, 1, 1], [], []>} : vector<16x307xbf16>, vector<307x192xbf16>, vector<16x192xf32> -> vector<16x192xf32>
    %c0_11 = arith.constant 0 : index
    %c0_12 = arith.constant 0 : index
    %11 = vector.load %arg7[%c0_11, %c0_12] : memref<1x192xf32, #tpu.memory_space<vmem>>, vector<1x192xf32>
    %12 = vector.broadcast %11 : vector<1x192xf32> to vector<16x192xf32>
    %13 = arith.addf %10, %12 : vector<16x192xf32>
    %cst_13 = arith.constant 0.000000e+00 : f32
    %14 = vector.broadcast %cst_13 : f32 to vector<16x192xf32>
    %15 = arith.maximumf %13, %14 : vector<16x192xf32>
    %16 = arith.truncf %7 : vector<16x256xf32> to vector<16x256xbf16>
    %c0_14 = arith.constant 0 : index
    %c0_15 = arith.constant 0 : index
    %17 = vector.load %arg8[%c0_14, %c0_15] : memref<256x256xbf16, #tpu.memory_space<vmem>>, vector<256x256xbf16>
    %cst_16 = arith.constant dense<0.000000e+00> : vector<16x256xf32>
    %18 = tpu.matmul %16, %17, %cst_16 {dimension_numbers = #tpu.dot_dimension_numbers<[1], [0], [0], [1], [0, 0, 1, 1], [], []>} : vector<16x256xbf16>, vector<256x256xbf16>, vector<16x256xf32> -> vector<16x256xf32>
    %19 = arith.truncf %15 : vector<16x192xf32> to vector<16x192xbf16>
    %c0_17 = arith.constant 0 : index
    %c0_18 = arith.constant 0 : index
    %20 = vector.load %arg9[%c0_17, %c0_18] : memref<192x256xbf16, #tpu.memory_space<vmem>>, vector<192x256xbf16>
    %cst_19 = arith.constant dense<0.000000e+00> : vector<16x256xf32>
    %21 = tpu.matmul %19, %20, %cst_19 {dimension_numbers = #tpu.dot_dimension_numbers<[1], [0], [0], [1], [0, 0, 1, 1], [], []>} : vector<16x192xbf16>, vector<192x256xbf16>, vector<16x256xf32> -> vector<16x256xf32>
    %22 = arith.addf %18, %21 : vector<16x256xf32>
    %c0_20 = arith.constant 0 : index
    %c0_21 = arith.constant 0 : index
    %23 = vector.load %arg10[%c0_20, %c0_21] : memref<1x256xf32, #tpu.memory_space<vmem>>, vector<1x256xf32>
    %24 = vector.broadcast %23 : vector<1x256xf32> to vector<16x256xf32>
    %25 = arith.addf %22, %24 : vector<16x256xf32>
    %cst_22 = arith.constant 0.000000e+00 : f32
    %26 = vector.broadcast %cst_22 : f32 to vector<16x256xf32>
    %27 = arith.maximumf %25, %26 : vector<16x256xf32>
    %28 = arith.truncf %27 : vector<16x256xf32> to vector<16x256xbf16>
    %c0_23 = arith.constant 0 : index
    %c0_24 = arith.constant 0 : index
    %29 = vector.load %arg11[%c0_23, %c0_24] : memref<256x24xbf16, #tpu.memory_space<vmem>>, vector<256x24xbf16>
    %cst_25 = arith.constant dense<0.000000e+00> : vector<16x24xf32>
    %30 = tpu.matmul %28, %29, %cst_25 {dimension_numbers = #tpu.dot_dimension_numbers<[1], [0], [0], [1], [0, 0, 1, 1], [], []>} : vector<16x256xbf16>, vector<256x24xbf16>, vector<16x24xf32> -> vector<16x24xf32>
    %c0_26 = arith.constant 0 : index
    %c0_27 = arith.constant 0 : index
    %31 = vector.load %arg12[%c0_26, %c0_27] : memref<1x24xf32, #tpu.memory_space<vmem>>, vector<1x24xf32>
    %32 = vector.broadcast %31 : vector<1x24xf32> to vector<16x24xf32>
    %33 = arith.addf %30, %32 : vector<16x24xf32>
    %34 = tpu.iota {dimensions = array<i32: 1>} : vector<16x24xi32>
    %cst_28 = arith.constant -5.000000e+00 : f32
    %cst_29 = arith.constant 2.000000e+00 : f32
    %35 = vector.broadcast %cst_28 : f32 to vector<16x24xf32>
    %36 = arith.maximumf %35, %33 : vector<16x24xf32>
    %37 = vector.broadcast %cst_29 : f32 to vector<16x24xf32>
    %38 = arith.minimumf %37, %36 : vector<16x24xf32>
    %39 = math.exp %38 : vector<16x24xf32>
    %c14_i32 = arith.constant 14 : i32
    %40 = vector.broadcast %c14_i32 : i32 to vector<16x24xi32>
    %41 = arith.cmpi sge, %34, %40 : vector<16x24xi32>
    %42 = arith.select %41, %39, %33 : vector<16x24xi1>, vector<16x24xf32>
    %c0_30 = arith.constant 0 : index
    %c0_31 = arith.constant 0 : index
    %43 = vector.load %arg3[%c0_30, %c0_31] : memref<16x1xf32, #tpu.memory_space<vmem>>, vector<16x1xf32>
    %cst_32 = arith.constant 5.000000e-01 : f32
    %44 = vector.broadcast %cst_32 : f32 to vector<16x1xf32>
    %45 = arith.cmpf ogt, %43, %44 : vector<16x1xf32>
    %c3_i32 = arith.constant 3 : i32
    %46 = vector.broadcast %c3_i32 : i32 to vector<16x24xi32>
    %47 = arith.cmpi eq, %34, %46 : vector<16x24xi32>
    %cst_33 = arith.constant dense<true> : vector<16x1xi1>
    %48 = arith.xori %45, %cst_33 : vector<16x1xi1>
    %49 = vector.broadcast %48 : vector<16x1xi1> to vector<16x24xi1>
    %50 = arith.andi %47, %49 : vector<16x24xi1>
    %cst_34 = arith.constant -1.000000e+09 : f32
    %51 = vector.broadcast %cst_34 : f32 to vector<16x24xf32>
    %52 = arith.select %50, %51, %42 : vector<16x24xi1>, vector<16x24xf32>
    %c0_35 = arith.constant 0 : index
    %c0_36 = arith.constant 0 : index
    %53 = vector.load %arg13[%c0_35, %c0_36] : memref<16x24xf32, #tpu.memory_space<vmem>>, vector<16x24xf32>
    tpu.vector_store %arg13[%c0_35, %c0_36], %52 {strides = array<i32>} : memref<16x24xf32, #tpu.memory_space<vmem>>, vector<16x24xf32>,
    return
  }
  func.func @transform_0(%arg0: i32) -> (i32, i32) {
    %c0_i32 = arith.constant 0 : i32
    %c0_i32_0 = arith.constant 0 : i32
    return %arg0, %c0_i32 : i32, i32
  }
  func.func @transform_1(%arg0: i32) -> (i32, i32) {
    %c0_i32 = arith.constant 0 : i32
    %c0_i32_0 = arith.constant 0 : i32
    return %arg0, %c0_i32 : i32, i32
  }
  func.func @transform_2(%arg0: i32) -> (i32, i32) {
    %c0_i32 = arith.constant 0 : i32
    %c0_i32_0 = arith.constant 0 : i32
    return %arg0, %c0_i32 : i32, i32
  }
  func.func @transform_3(%arg0: i32) -> (i32, i32) {
    %c0_i32 = arith.constant 0 : i32
    %c0_i32_0 = arith.constant 0 : i32
    %c0_i32_1 = arith.constant 0 : i32
    return %c0_i32, %c0_i32_0 : i32, i32
  }
  func.func @transform_4(%arg0: i32) -> (i32, i32) {
    %c0_i32 = arith.constant 0 : i32
    %c0_i32_0 = arith.constant 0 : i32
    %c0_i32_1 = arith.constant 0 : i32
    return %c0_i32, %c0_i32_0 : i32, i32
  }
  func.func @transform_5(%arg0: i32) -> (i32, i32) {
    %c0_i32 = arith.constant 0 : i32
    %c0_i32_0 = arith.constant 0 : i32
    %c0_i32_1 = arith.constant 0 : i32
    return %c0_i32, %c0_i32_0 : i32, i32
  }
  func.func @transform_6(%arg0: i32) -> (i32, i32) {
    %c0_i32 = arith.constant 0 : i32
    %c0_i32_0 = arith.constant 0 : i32
    %c0_i32_1 = arith.constant 0 : i32
    return %c0_i32, %c0_i32_0 : i32, i32
  }
  func.func @transform_7(%arg0: i32) -> (i32, i32) {
    %c0_i32 = arith.constant 0 : i32
    %c0_i32_0 = arith.constant 0 : i32
    %c0_i32_1 = arith.constant 0 : i32
    return %c0_i32, %c0_i32_0 : i32, i32
  }
  func.func @transform_8(%arg0: i32) -> (i32, i32) {
    %c0_i32 = arith.constant 0 : i32
    %c0_i32_0 = arith.constant 0 : i32
    %c0_i32_1 = arith.constant 0 : i32
    return %c0_i32, %c0_i32_0 : i32, i32
  }
  func.func @transform_9(%arg0: i32) -> (i32, i32) {
    %c0_i32 = arith.constant 0 : i32
    %c0_i32_0 = arith.constant 0 : i32
    %c0_i32_1 = arith.constant 0 : i32
    return %c0_i32, %c0_i32_0 : i32, i32
  }
  func.func @transform_10(%arg0: i32) -> (i32, i32) {
    %c0_i32 = arith.constant 0 : i32
    %c0_i32_0 = arith.constant 0 : i32
    %c0_i32_1 = arith.constant 0 : i32
    return %c0_i32, %c0_i32_0 : i32, i32
  }
  func.func @transform_11(%arg0: i32) -> (i32, i32) {
    %c0_i32 = arith.constant 0 : i32
    %c0_i32_0 = arith.constant 0 : i32
    %c0_i32_1 = arith.constant 0 : i32
    return %c0_i32, %c0_i32_0 : i32, i32
  }
  func.func @transform_12(%arg0: i32) -> (i32, i32) {
    %c0_i32 = arith.constant 0 : i32
    %c0_i32_0 = arith.constant 0 : i32
    return %arg0, %c0_i32 : i32, i32
  }
}

</mosaic_0001>

<bundles_post_ra>
// kernel: tpu_custom_call.1
= control target key start
LH: loop header
LB: loop body
LE: loop exit
PB: predicated region body
PF: predicated region fallthrough
CT: control target
= control target key end

     0   :  { %17 = vsyncpa [#allocation3], 0  ;;  %s5512_s0 = inlined_call_operand.hbm [shape: bf16[16,2600], index: 0, kind: input, shape index: {}]   ;;  %s5513_s1 = inlined_call_operand.hbm [shape: bf16[16,307], index: 1, kind: input, shape index: {}]   ;;  %s5514_s2 = inlined_call_operand.vmem [shape: f32[16,1], index: 2, kind: input, shape index: {}]   ;;  %s5515_s3 = inlined_call_operand.hbm [shape: bf16[2600,256], index: 3, kind: input, shape index: {}]   ;;  %s5516_s4 = inlined_call_operand.hbm [shape: f32[1,256], index: 4, kind: input, shape index: {}]   ;;  %s5517_s5 = inlined_call_operand.vmem [shape: bf16[307,192], index: 5, kind: input, shape index: {}]   ;;  %s5518_s6 = inlined_call_operand.hbm [shape: f32[1,192], index: 6, kind: input, shape index: {}]   ;;  %s5519_s7 = inlined_call_operand.hbm [shape: bf16[256,256], index: 7, kind: input, shape index: {}]   ;;  %s5520_s8 = inlined_call_operand.hbm [shape: bf16[192,256], index: 8, kind: input, shape index: {}]   ;;  %s5521_s9 = inlined_call_operand.hbm [shape: f32[1,256], index: 9, kind: input, shape index: {}]   ;;  %s5522_s10 = inlined_call_operand.vmem [shape: bf16[256,24], index: 10, kind: input, shape index: {}]   ;;  %s5523_s11 = inlined_call_operand.hbm [shape: f32[1,24], index: 11, kind: input, shape index: {}]   ;;  %s5524_s12 = inlined_call_operand.hbm [shape: f32[16,24], index: 12, kind: output, shape index: {}]  }
   0x1   :  { %18 = vsyncpa [#allocation6], 0 }
   0x2   :  { %19 = vsyncpa [#allocation9], 0 }
   0x3   :  { %20 = vsyncpa [#allocation12], 0 }
   0x4   :  { %21 = vsyncpa [#allocation15], 0 }
   0x5   :  { %22 = vsyncpa [#allocation4], 0  ;;  %s5196_s21 = smov [#allocation5]  }
   0x6   :  { %s40_s22 = sshll.u32 %s5196_s21, 4  ;;  %s41_s22 = int_to_ptr.vmem [resolvable:$true] %s40_s22 }
   0x7   :  { %s4992_s23 = scalar_lea.vmem %s41_s22, 384  ;;  %p4997_p1 = scmp.lt.s32.totalorder %s41_s22, %s41_s22 }
   0x8   :  { %p4993_p0 = scmp.ne.s32.totalorder %s41_s22, %s4992_s23  ;;  %p4998_p2 = scmp.lt.s32.totalorder %s4992_s23, %s4992_s23 }
   0xa   :  { %p4999_p3 = por %p4998_p2, %p4997_p1 }
   0xc   :  { %p5000_p4 = pnand %p4999_p3, %p4993_p0 }
   0xe   :  { %5003 = shalt.err (!%p5000_p4)
}
   0xf   :  { %s5197_s24 = smov 192   ;;  %s5198_s25 = smov 12  }
  0x10   :  { %46 = dma.hbm_to_vmem [thread:$0]  %s5513_s1, 384, %s41_s22, [#allocation6], %s5197_s24, %s5197_s24, %s5198_s25  }
  0x11   :  { %s5199_s28 = smov [#allocation8]  }
  0x12   :  { %s67_s29 = sshll.u32 %s5199_s28, 4  ;;  %s68_s29 = int_to_ptr.vmem [resolvable:$true] %s67_s29 }
  0x13   :  { %s5012_s30 = scalar_lea.vmem %s68_s29, 32  ;;  %p5017_p6 = scmp.lt.s32.totalorder %s68_s29, %s68_s29 }
  0x14   :  { %p5013_p5 = scmp.ne.s32.totalorder %s68_s29, %s5012_s30  ;;  %p5018_p7 = scmp.lt.s32.totalorder %s5012_s30, %s5012_s30 }
  0x16   :  { %p5019_p8 = por %p5018_p7, %p5017_p6 }
  0x18   :  { %p5020_p9 = pnand %p5019_p8, %p5013_p5 }
  0x1a   :  { %5023 = shalt.err (!%p5020_p9)
}
  0x1b   :  { %70 = dma.hbm_to_vmem [thread:$0]  %s5516_s4, 32, %s68_s29, [#allocation9]  }
  0x1c   :  { %s5200_s15 = smov [#allocation11]   ;;  %s5201_s17 = smov [#allocation14]  }
  0x1d   :  { %s88_s16 = sshll.u32 %s5200_s15, 4  ;;  %s113_s18 = sshll.u32 %s5201_s17, 4  ;;  %s89_s16 = int_to_ptr.vmem [resolvable:$true] %s88_s16  ;;  %s114_s18 = int_to_ptr.vmem [resolvable:$true] %s113_s18 }
  0x1e   :  { %s5032_s1 = scalar_lea.vmem %s89_s16, 4096  ;;  %p5037_p11 = scmp.lt.s32.totalorder %s89_s16, %s89_s16 }
  0x1f   :  { %p5033_p10 = scmp.ne.s32.totalorder %s89_s16, %s5032_s1  ;;  %p5038_p12 = scmp.lt.s32.totalorder %s5032_s1, %s5032_s1 }
  0x21   :  { %p5039_p13 = por %p5038_p12, %p5037_p11 }
  0x23   :  { %p5040_p0 = pnand %p5039_p13, %p5033_p10 }
  0x25   :  { %5043 = shalt.err (!%p5040_p0)
}
  0x26   :  { %s5202_s19 = smov 128   ;;  %s5203_s20 = smov 8  }
  0x27   :  { %94 = dma.hbm_to_vmem [thread:$0]  %s5519_s7, 4096, %s89_s16, [#allocation12], %s5202_s19, %s5202_s19, %s5203_s20  }
  0x28   :  { %s5052_s22 = scalar_lea.vmem %s114_s18, 32  ;;  %p5057_p2 = scmp.lt.s32.totalorder %s114_s18, %s114_s18 }
  0x29   :  { %p5053_p1 = scmp.ne.s32.totalorder %s114_s18, %s5052_s22  ;;  %p5058_p3 = scmp.lt.s32.totalorder %s5052_s22, %s5052_s22 }
  0x2b   :  { %p5059_p4 = por %p5058_p3, %p5057_p2 }
  0x2d   :  { %p5060_p5 = pnand %p5059_p4, %p5053_p1 }
  0x2f   :  { %5063 = shalt.err (!%p5060_p5)
}
  0x30   :  { %116 = dma.hbm_to_vmem [thread:$0]  %s5521_s9, 32, %s114_s18, [#allocation15]  }
  0x31   :  { %s5204_s25 = smov [#allocation2]  }
  0x32   :  { %s28_s26 = sshll.u32 %s5204_s25, 4  ;;  %s29_s26 = int_to_ptr.vmem [resolvable:$true] %s28_s26 }
  0x33   :  { %s5072_s27 = scalar_lea.vmem %s29_s26, 2688  ;;  %p5077_p7 = scmp.lt.s32.totalorder %s29_s26, %s29_s26 }
  0x34   :  { %p5073_p6 = scmp.ne.s32.totalorder %s29_s26, %s5072_s27  ;;  %p5078_p8 = scmp.lt.s32.totalorder %s5072_s27, %s5072_s27 }
  0x36   :  { %p5079_p9 = por %p5078_p8, %p5077_p7 }
  0x38   :  { %p5080_p10 = pnand %p5079_p9, %p5073_p6 }
  0x3a   :  { %5083 = shalt.err (!%p5080_p10)
}
  0x3b   :  { %s5205_s7 = smov 1344   ;;  %s5206_s28 = smov 84  }
  0x3c   :  { %34 = dma.hbm_to_vmem [thread:$0]  %s5512_s0, 2688, %s29_s26, [#allocation3], %s5205_s7, %s5205_s7, %s5206_s28  }
  0x3d   :  { %s5207_s13 = smov [#allocation7]   ;;  %s5208_s9 = smov [#allocation10]  }
  0x3e   :  { %s54_s14 = sshll.u32 %s5207_s13, 4  ;;  %s79_s15 = sshll.u32 %s5208_s9, 4  ;;  %s55_s14 = int_to_ptr.vmem [resolvable:$true] %s54_s14  ;;  %s80_s15 = int_to_ptr.vmem [resolvable:$true] %s79_s15 }
  0x3f   :  { %s5092_s16 = scalar_lea.vmem %s55_s14, 41600  ;;  %p5097_p12 = scmp.lt.s32.totalorder %s55_s14, %s55_s14 }
  0x40   :  { %p5093_p11 = scmp.ne.s32.totalorder %s55_s14, %s5092_s16  ;;  %p5098_p13 = scmp.lt.s32.totalorder %s5092_s16, %s5092_s16 }
  0x42   :  { %p5099_p0 = por %p5098_p13, %p5097_p12 }
  0x44   :  { %p5100_p1 = pnand %p5099_p0, %p5093_p11 }
  0x46   :  { %5103 = shalt.err (!%p5100_p1)
}
  0x47   :  { %60 = dma.hbm_to_vmem [thread:$0]  %s5515_s3, 41600, %s55_s14, [#allocation6], %s5202_s19, %s5202_s19, %s5203_s20  }
  0x48   :  { %s5112_s0 = scalar_lea.vmem %s80_s15, 32  ;;  %p5117_p3 = scmp.lt.s32.totalorder %s80_s15, %s80_s15 }
  0x49   :  { %p5113_p2 = scmp.ne.s32.totalorder %s80_s15, %s5112_s0  ;;  %p5118_p4 = scmp.lt.s32.totalorder %s5112_s0, %s5112_s0 }
  0x4b   :  { %p5119_p5 = por %p5118_p4, %p5117_p3 }
  0x4d   :  { %p5120_p6 = pnand %p5119_p5, %p5113_p2 }
  0x4f   :  { %5123 = shalt.err (!%p5120_p6)
}
  0x50   :  { %82 = dma.hbm_to_vmem [thread:$0]  %s5518_s6, 32, %s80_s15, [#allocation9]  }
  0x51   :  { %s5209_s4 = smov [#allocation13]   ;;  %s5210_s23 = smov [#allocation16]  }
  0x52   :  { %s100_s22 = sshll.u32 %s5209_s4, 4  ;;  %s125_s24 = sshll.u32 %s5210_s23, 4  ;;  %s101_s22 = int_to_ptr.vmem [resolvable:$true] %s100_s22  ;;  %s126_s24 = int_to_ptr.vmem [resolvable:$true] %s125_s24 }
  0x53   :  { %s5132_s25 = scalar_lea.vmem %s101_s22, 3072  ;;  %p5137_p8 = scmp.lt.s32.totalorder %s101_s22, %s101_s22 }
  0x54   :  { %p5133_p7 = scmp.ne.s32.totalorder %s101_s22, %s5132_s25  ;;  %p5138_p9 = scmp.lt.s32.totalorder %s5132_s25, %s5132_s25 }
  0x56   :  { %p5139_p10 = por %p5138_p9, %p5137_p8 }
  0x58   :  { %p5140_p11 = pnand %p5139_p10, %p5133_p7 }
  0x5a   :  { %5143 = shalt.err (!%p5140_p11)
}
  0x5b   :  { %106 = dma.hbm_to_vmem [thread:$0]  %s5520_s8, 3072, %s101_s22, [#allocation12], %s5202_s19, %s5202_s19, %s5203_s20  }
  0x5c   :  { %s5152_s6 = scalar_lea.vmem %s126_s24, 16  ;;  %s5156_s27 = scalar_lea.vmem %s126_s24, 32 }
  0x5d   :  { %p5153_p12 = scmp.ne.s32.totalorder %s126_s24, %s5152_s6  ;;  %p5157_p13 = scmp.lt.s32.totalorder %s126_s24, %s126_s24 }
  0x5e   :  { %p5158_p0 = scmp.lt.s32.totalorder %s5156_s27, %s5152_s6 }
  0x60   :  { %p5159_p1 = por %p5158_p0, %p5157_p13 }
  0x62   :  { %p5160_p2 = pnand %p5159_p1, %p5153_p12 }
  0x64   :  { %5163 = shalt.err (!%p5160_p2)
}
  0x65   :  { %128 = dma.hbm_to_vmem [thread:$0]  %s5523_s11, 16, %s126_s24, [#allocation15]  }
  0x66   :  { %5184 = dma.done.wait [#allocation3], 2688  }
  0x67   :  { %5185 = vsyncadd [#allocation3], 4294964608 }
  0x68   :  { %5186 = dma.done.wait [#allocation6], 41984  }
  0x69   :  { %5187 = vsyncadd [#allocation6], 4294925312 }
  0x6a   :  { %5188 = dma.done.wait [#allocation9], 64  }
  0x6b   :  { %5189 = vsyncadd [#allocation9], 4294967232 }
  0x6c   :  { %5190 = dma.done.wait [#allocation12], 7168  }
  0x6d   :  { %5191 = vsyncadd [#allocation12], 4294960128 }
  0x6e   :  { %5192 = dma.done.wait [#allocation15], 48  }
  0x6f   :  { %5193 = vsyncadd [#allocation15], 4294967248  ;;  %v4298_v0 = vld [vmem:[#allocation7 + $0x74] ss:$8 sps:$4 sm:$0xff]   ;;  %v4302_v2 = vld [vmem:[#allocation7 + $0x70] ss:$8 sps:$4 sm:$0xff]  }
  0x70   :  { %v4300_v1 = vld [vmem:[#allocation7 + $0x174] ss:$8 sps:$4 sm:$0xff]   ;;  %2257 = vmatprep.subr.bf16.mxu0 %v4298_v0  ;;  %v4303_v3 = vld [vmem:[#allocation7 + $0x170] ss:$8 sps:$4 sm:$0xff]   ;;  %v4304_v4 = vld [vmem:[#allocation7 + $0x64] ss:$8 sps:$4 sm:$0xff]  }
  0x71   :  { %2300 = vmatprep.subr.bf16.mxu1 %v4300_v1  ;;  %2258 = vmatpush1.bf16.msra.mxu0 %v4302_v2  ;;  %v4306_v5 = vld [vmem:[#allocation7 + $0x164] ss:$8 sps:$4 sm:$0xff]   ;;  %v4308_v6 = vld [vmem:[#allocation7 + $0x60] ss:$8 sps:$4 sm:$0xff]   ;;  %v4310_v8 = vld [vmem:[#allocation7 + $0x54] ss:$8 sps:$4 sm:$0xff]  }
  0x72   :  { %2301 = vmatpush1.bf16.msra.mxu1 %v4303_v3  ;;  %2259 = vmatprep.subr.bf16.mxu0 %v4304_v4  ;;  %v4309_v7 = vld [vmem:[#allocation7 + $0x160] ss:$8 sps:$4 sm:$0xff]   ;;  %v4312_v9 = vld [vmem:[#allocation7 + $0x154] ss:$8 sps:$4 sm:$0xff]   ;;  %v4314_v10 = vld [vmem:[#allocation7 + $0x50] ss:$8 sps:$4 sm:$0xff]  }
  0x73   :  { %2302 = vmatprep.subr.bf16.mxu1 %v4306_v5  ;;  %v4315_v11 = vld [vmem:[#allocation7 + $0x150] ss:$8 sps:$4 sm:$0xff]   ;;  %v4316_v12 = vld [vmem:[#allocation7 + $0x44] ss:$8 sps:$4 sm:$0xff]   ;;  %v4320_v14 = vld [vmem:[#allocation7 + $0x40] ss:$8 sps:$4 sm:$0xff]  }
  0x74   :  { %v4318_v13 = vld [vmem:[#allocation7 + $0x144] ss:$8 sps:$4 sm:$0xff]   ;;  %v4321_v15 = vld [vmem:[#allocation7 + $0x140] ss:$8 sps:$4 sm:$0xff]   ;;  %v4322_v16 = vld [vmem:[#allocation7 + $0x34] ss:$8 sps:$4 sm:$0xff]  }
  0x75   :  { %2260 = vmatpush1.bf16.msra.mxu0 %v4308_v6  ;;  %v4324_v17 = vld [vmem:[#allocation7 + $0x134] ss:$8 sps:$4 sm:$0xff]   ;;  %v4326_v18 = vld [vmem:[#allocation7 + $0x30] ss:$8 sps:$4 sm:$0xff]   ;;  %v4328_v20 = vld [vmem:[#allocation7 + $0x24] ss:$8 sps:$4 sm:$0xff]  }
  0x76   :  { %2303 = vmatpush1.bf16.msra.mxu1 %v4309_v7  ;;  %2261 = vmatprep.subr.bf16.mxu0 %v4310_v8  ;;  %v4327_v19 = vld [vmem:[#allocation7 + $0x130] ss:$8 sps:$4 sm:$0xff]   ;;  %v4330_v21 = vld [vmem:[#allocation7 + $0x124] ss:$8 sps:$4 sm:$0xff]   ;;  %v4332_v22 = vld [vmem:[#allocation7 + $0x20] ss:$8 sps:$4 sm:$0xff]  }
  0x77   :  { %2304 = vmatprep.subr.bf16.mxu1 %v4312_v9  ;;  %v4333_v23 = vld [vmem:[#allocation7 + $0x120] ss:$8 sps:$4 sm:$0xff]   ;;  %v4334_v24 = vld [vmem:[#allocation7 + $0x14] ss:$8 sps:$4 sm:$0xff]   ;;  %v4338_v26 = vld [vmem:[#allocation7 + $0x10] ss:$8 sps:$4 sm:$0xff]  }
  0x78   :  { %v4336_v25 = vld [vmem:[#allocation7 + $0x114] ss:$8 sps:$4 sm:$0xff]   ;;  %v4339_v27 = vld [vmem:[#allocation7 + $0x110] ss:$8 sps:$4 sm:$0xff]   ;;  %v4340_v28 = vld [vmem:[#allocation7 + $0x4] ss:$8 sps:$4 sm:$0xff]  }
  0x79   :  { %2262 = vmatpush1.bf16.msra.mxu0 %v4314_v10  ;;  %v4342_v29 = vld [vmem:[#allocation7 + $0x104] ss:$8 sps:$4 sm:$0xff]   ;;  %v4344_v30 = vld [vmem:[#allocation7] ss:$8 sps:$4 sm:$0xff]   ;;  %v4346_v32 = vld [vmem:[#allocation7 + $0xf4] ss:$8 sps:$4 sm:$0xff]  }
  0x7a   :  { %2305 = vmatpush1.bf16.msra.mxu1 %v4315_v11  ;;  %2263 = vmatprep.subr.bf16.mxu0 %v4316_v12  ;;  %v4345_v31 = vld [vmem:[#allocation7 + $0x100] ss:$8 sps:$4 sm:$0xff]   ;;  %v4348_v33 = vld [vmem:[#allocation7 + $0x1f4] ss:$8 sps:$4 sm:$0xff]   ;;  %v4350_v34 = vld [vmem:[#allocation7 + $0xf0] ss:$8 sps:$4 sm:$0xff]  }
  0x7b   :  { %2306 = vmatprep.subr.bf16.mxu1 %v4318_v13  ;;  %v4351_v35 = vld [vmem:[#allocation7 + $0x1f0] ss:$8 sps:$4 sm:$0xff]   ;;  %v4352_v36 = vld [vmem:[#allocation7 + $0xe4] ss:$8 sps:$4 sm:$0xff]   ;;  %v4356_v38 = vld [vmem:[#allocation7 + $0xe0] ss:$8 sps:$4 sm:$0xff]  }
  0x7c   :  { %v4354_v37 = vld [vmem:[#allocation7 + $0x1e4] ss:$8 sps:$4 sm:$0xff]   ;;  %v4357_v39 = vld [vmem:[#allocation7 + $0x1e0] ss:$8 sps:$4 sm:$0xff]   ;;  %v4358_v40 = vld [vmem:[#allocation7 + $0xd4] ss:$8 sps:$4 sm:$0xff]  }
  0x7d   :  { %2264 = vmatpush1.bf16.msra.mxu0 %v4320_v14  ;;  %v4360_v41 = vld [vmem:[#allocation7 + $0x1d4] ss:$8 sps:$4 sm:$0xff]   ;;  %v4362_v42 = vld [vmem:[#allocation7 + $0xd0] ss:$8 sps:$4 sm:$0xff]   ;;  %v4364_v44 = vld [vmem:[#allocation7 + $0xc4] ss:$8 sps:$4 sm:$0xff]  }
  0x7e   :  { %2307 = vmatpush1.bf16.msra.mxu1 %v4321_v15  ;;  %2265 = vmatprep.subr.bf16.mxu0 %v4322_v16  ;;  %v4363_v43 = vld [vmem:[#allocation7 + $0x1d0] ss:$8 sps:$4 sm:$0xff]   ;;  %v4366_v45 = vld [vmem:[#allocation7 + $0x1c4] ss:$8 sps:$4 sm:$0xff]   ;;  %v4368_v46 = vld [vmem:[#allocation7 + $0xc0] ss:$8 sps:$4 sm:$0xff]  }
  0x7f   :  { %2308 = vmatprep.subr.bf16.mxu1 %v4324_v17  ;;  %v4369_v47 = vld [vmem:[#allocation7 + $0x1c0] ss:$8 sps:$4 sm:$0xff]   ;;  %v4370_v48 = vld [vmem:[#allocation7 + $0xb4] ss:$8 sps:$4 sm:$0xff]   ;;  %v4396_v49 = vld [vmem:[#allocation2 + $0x4] ss:$84 sps:$4 sm:$0xff]  }
  0x80   :  { %v4372_v50 = vld [vmem:[#allocation7 + $0x1b4] ss:$8 sps:$4 sm:$0xff]   ;;  %v4399_v51 = vld [vmem:[#allocation2 + $0xc] ss:$84 sps:$4 sm:$0xff]   ;;  %2289 = vmatprep.mubr.bf16.mxu0 %v4396_v49  ;;  %v4374_v52 = vld [vmem:[#allocation7 + $0xb0] ss:$8 sps:$4 sm:$0xff]  }
  0x81   :  { %2266 = vmatpush1.bf16.msra.mxu0 %v4326_v18  ;;  %v4375_v53 = vld [vmem:[#allocation7 + $0x1b0] ss:$8 sps:$4 sm:$0xff]   ;;  %2332 = vmatprep.mubr.bf16.mxu1 %v4399_v51  ;;  %v4376_v54 = vld [vmem:[#allocation7 + $0xa4] ss:$8 sps:$4 sm:$0xff]   ;;  %v4380_v56 = vld [vmem:[#allocation7 + $0xa0] ss:$8 sps:$4 sm:$0xff]  }
  0x82   :  { %2309 = vmatpush1.bf16.msra.mxu1 %v4327_v19  ;;  %2267 = vmatprep.subr.bf16.mxu0 %v4328_v20  ;;  %v4378_v55 = vld [vmem:[#allocation7 + $0x1a4] ss:$8 sps:$4 sm:$0xff]   ;;  %v4381_v57 = vld [vmem:[#allocation7 + $0x1a0] ss:$8 sps:$4 sm:$0xff]   ;;  %v4382_v58 = vld [vmem:[#allocation7 + $0x94] ss:$8 sps:$4 sm:$0xff]  }
  0x83   :  { %2310 = vmatprep.subr.bf16.mxu1 %v4330_v21  ;;  %v4384_v59 = vld [vmem:[#allocation7 + $0x194] ss:$8 sps:$4 sm:$0xff]   ;;  %v4386_v60 = vld [vmem:[#allocation7 + $0x90] ss:$8 sps:$4 sm:$0xff]   ;;  %v4388_v62 = vld [vmem:[#allocation7 + $0x84] ss:$8 sps:$4 sm:$0xff]  }
  0x84   :  { %v4387_v61 = vld [vmem:[#allocation7 + $0x190] ss:$8 sps:$4 sm:$0xff]   ;;  %v4390_v63 = vld [vmem:[#allocation7 + $0x184] ss:$8 sps:$4 sm:$0xff]   ;;  %v4392_v0 = vld [vmem:[#allocation7 + $0x80] ss:$8 sps:$4 sm:$0xff]  }
  0x85   :  { %2268 = vmatpush1.bf16.msra.mxu0 %v4332_v22  ;;  %v4393_v1 = vld [vmem:[#allocation7 + $0x180] ss:$8 sps:$4 sm:$0xff]   ;;  %v4402_v2 = vld [vmem:[#allocation7 + $0x274] ss:$8 sps:$4 sm:$0xff]   ;;  %v4400_v6 = vld [vmem:[#allocation7 + $0x270] ss:$8 sps:$4 sm:$0xff]  }
  0x86   :  { %2311 = vmatpush1.bf16.msra.mxu1 %v4333_v23  ;;  %2269 = vmatprep.subr.bf16.mxu0 %v4334_v24  ;;  %v4405_v3 = vld [vmem:[#allocation7 + $0x374] ss:$8 sps:$4 sm:$0xff]   ;;  %v4403_v7 = vld [vmem:[#allocation7 + $0x370] ss:$8 sps:$4 sm:$0xff]   ;;  %v4408_v8 = vld [vmem:[#allocation7 + $0x264] ss:$8 sps:$4 sm:$0xff]  }
  0x87   :  { %2312 = vmatprep.subr.bf16.mxu1 %v4336_v25  ;;  %v4394_v4 = vld [vmem:[#allocation2] ss:$84 sps:$4 sm:$0xff]   ;;  %v4397_v5 = vld [vmem:[#allocation2 + $0x8] ss:$84 sps:$4 sm:$0xff]   ;;  %v4411_v9 = vld [vmem:[#allocation7 + $0x364] ss:$8 sps:$4 sm:$0xff]  }
  0x88   :  { %v4406_v10 = vld [vmem:[#allocation7 + $0x260] ss:$8 sps:$4 sm:$0xff]   ;;  %v4414_v12 = vld [vmem:[#allocation7 + $0x254] ss:$8 sps:$4 sm:$0xff]   ;;  %v4412_v14 = vld [vmem:[#allocation7 + $0x250] ss:$8 sps:$4 sm:$0xff]  }
  0x89   :  { %2270 = vmatpush1.bf16.msra.mxu0 %v4338_v26  ;;  %v4409_v11 = vld [vmem:[#allocation7 + $0x360] ss:$8 sps:$4 sm:$0xff]   ;;  %v4417_v13 = vld [vmem:[#allocation7 + $0x354] ss:$8 sps:$4 sm:$0xff]   ;;  %v4415_v15 = vld [vmem:[#allocation7 + $0x350] ss:$8 sps:$4 sm:$0xff]  }
  0x8a   :  { %2313 = vmatpush1.bf16.msra.mxu1 %v4339_v27  ;;  %2271 = vmatprep.subr.bf16.mxu0 %v4340_v28  ;;  %v4420_v16 = vld [vmem:[#allocation7 + $0x244] ss:$8 sps:$4 sm:$0xff]   ;;  %v4418_v18 = vld [vmem:[#allocation7 + $0x240] ss:$8 sps:$4 sm:$0xff]   ;;  %v4426_v20 = vld [vmem:[#allocation7 + $0x234] ss:$8 sps:$4 sm:$0xff]  }
  0x8b   :  { %2314 = vmatprep.subr.bf16.mxu1 %v4342_v29  ;;  %v4423_v17 = vld [vmem:[#allocation7 + $0x344] ss:$8 sps:$4 sm:$0xff]   ;;  %v4421_v19 = vld [vmem:[#allocation7 + $0x340] ss:$8 sps:$4 sm:$0xff]   ;;  %v4429_v21 = vld [vmem:[#allocation7 + $0x334] ss:$8 sps:$4 sm:$0xff]  }
  0x8c   :  { %v4424_v22 = vld [vmem:[#allocation7 + $0x230] ss:$8 sps:$4 sm:$0xff]   ;;  %v4432_v24 = vld [vmem:[#allocation7 + $0x224] ss:$8 sps:$4 sm:$0xff]   ;;  %v4430_v26 = vld [vmem:[#allocation7 + $0x220] ss:$8 sps:$4 sm:$0xff]  }
  0x8d   :  { %2272 = vmatpush1.bf16.msra.mxu0 %v4344_v30  ;;  %v4427_v23 = vld [vmem:[#allocation7 + $0x330] ss:$8 sps:$4 sm:$0xff]   ;;  %v4435_v25 = vld [vmem:[#allocation7 + $0x324] ss:$8 sps:$4 sm:$0xff]   ;;  %v4433_v27 = vld [vmem:[#allocation7 + $0x320] ss:$8 sps:$4 sm:$0xff]  }
  0x8e   :  { %2315 = vmatpush1.bf16.msra.mxu1 %v4345_v31  ;;  %2273 = vmatprep.subr.bf16.mxu0 %v4346_v32  ;;  %v4438_v28 = vld [vmem:[#allocation7 + $0x214] ss:$8 sps:$4 sm:$0xff]   ;;  %v4436_v30 = vld [vmem:[#allocation7 + $0x210] ss:$8 sps:$4 sm:$0xff]   ;;  %v4444_v32 = vld [vmem:[#allocation7 + $0x204] ss:$8 sps:$4 sm:$0xff]  }
  0x8f   :  { %2316 = vmatprep.subr.bf16.mxu1 %v4348_v33  ;;  %v4441_v29 = vld [vmem:[#allocation7 + $0x314] ss:$8 sps:$4 sm:$0xff]   ;;  %v4439_v31 = vld [vmem:[#allocation7 + $0x310] ss:$8 sps:$4 sm:$0xff]   ;;  %v4447_v33 = vld [vmem:[#allocation7 + $0x304] ss:$8 sps:$4 sm:$0xff]  }
  0x90   :  { %v4463_v49 = vld [vmem:[#allocation7 + $0x3d0] ss:$8 sps:$4 sm:$0xff]   ;;  %v4471_v51 = vld [vmem:[#allocation7 + $0x3c4] ss:$8 sps:$4 sm:$0xff]   ;;  %vm2250_vm0 = vcmask 1043456   ;;  %vm3003_vm1 = vcmask 1040384  }
  0x91   :  { %2274 = vmatpush2.bf16.msra.mxu0 %v4350_v34  ;;  %v4498_v34 = vld [vmem:[#allocation2 + $0x14] ss:$84 sps:$4 sm:$0xff]   ;;  %vm3004_vm2 = vcmask 1041408   ;;  %vm2246_vm3 = vcmask 326656   ;;  %vm2999_vm4 = vcmask 416768   ;;  %vm3283_vm5 = vcmask 523264  }
  0x92   :  { %2317 = vmatpush2.bf16.msra.mxu1 %v4351_v35  ;;  %2275 = vmatprep.subr.bf16.mxu0 %v4352_v36  ;;  %v4501_v35 = vld [vmem:[#allocation2 + $0x1c] ss:$84 sps:$4 sm:$0xff]   ;;  %v4442_v36 = vld [vmem:[#allocation7 + $0x200] ss:$8 sps:$4 sm:$0xff]   ;;  %vm5213_vm8 = vmmov 1   ;;  %vm3765_vm15 = vcmask 195584  }
  0x93   :  { %2318 = vmatprep.subr.bf16.mxu1 %v4354_v37  ;;  %v4445_v37 = vld [vmem:[#allocation7 + $0x300] ss:$8 sps:$4 sm:$0xff]  }
  0x95   :  { %2276 = vmatpush2.bf16.msra.mxu0 %v4356_v38  ;;  %v4450_v38 = vld [vmem:[#allocation7 + $0x2f4] ss:$8 sps:$4 sm:$0xff]  }
  0x96   :  { %2319 = vmatpush2.bf16.msra.mxu1 %v4357_v39  ;;  %2277 = vmatprep.subr.bf16.mxu0 %v4358_v40  ;;  %v4453_v39 = vld [vmem:[#allocation7 + $0x3f4] ss:$8 sps:$4 sm:$0xff]   ;;  %v4448_v40 = vld [vmem:[#allocation7 + $0x2f0] ss:$8 sps:$4 sm:$0xff]  }
  0x97   :  { %2320 = vmatprep.subr.bf16.mxu1 %v4360_v41  ;;  %v4451_v41 = vld [vmem:[#allocation7 + $0x3f0] ss:$8 sps:$4 sm:$0xff]  }
  0x99   :  { %2278 = vmatpush2.bf16.msra.mxu0 %v4362_v42  ;;  %v4456_v42 = vld [vmem:[#allocation7 + $0x2e4] ss:$8 sps:$4 sm:$0xff]  }
  0x9a   :  { %2321 = vmatpush2.bf16.msra.mxu1 %v4363_v43  ;;  %2279 = vmatprep.subr.bf16.mxu0 %v4364_v44  ;;  %v4459_v43 = vld [vmem:[#allocation7 + $0x3e4] ss:$8 sps:$4 sm:$0xff]   ;;  %v4454_v44 = vld [vmem:[#allocation7 + $0x2e0] ss:$8 sps:$4 sm:$0xff]  }
  0x9b   :  { %2322 = vmatprep.subr.bf16.mxu1 %v4366_v45  ;;  %v4457_v45 = vld [vmem:[#allocation7 + $0x3e0] ss:$8 sps:$4 sm:$0xff]  }
  0x9d   :  { %2280 = vmatpush2.bf16.msra.mxu0 %v4368_v46  ;;  %v4462_v46 = vld [vmem:[#allocation7 + $0x2d4] ss:$8 sps:$4 sm:$0xff]  }
  0x9e   :  { %2323 = vmatpush2.bf16.msra.mxu1 %v4369_v47  ;;  %2281 = vmatprep.subr.bf16.mxu0 %v4370_v48  ;;  %v4465_v47 = vld [vmem:[#allocation7 + $0x3d4] ss:$8 sps:$4 sm:$0xff]   ;;  %v4460_v48 = vld [vmem:[#allocation7 + $0x2d0] ss:$8 sps:$4 sm:$0xff]  }
  0x9f   :  { %2324 = vmatprep.subr.bf16.mxu1 %v4372_v50  ;;  %v4468_v50 = vld [vmem:[#allocation7 + $0x2c4] ss:$8 sps:$4 sm:$0xff]  }
  0xa1   :  { %2282 = vmatpush2.bf16.msra.mxu0 %v4374_v52  ;;  %v4466_v52 = vld [vmem:[#allocation7 + $0x2c0] ss:$8 sps:$4 sm:$0xff]  }
  0xa2   :  { %2325 = vmatpush2.bf16.msra.mxu1 %v4375_v53  ;;  %2283 = vmatprep.subr.bf16.mxu0 %v4376_v54  ;;  %v4469_v53 = vld [vmem:[#allocation7 + $0x3c0] ss:$8 sps:$4 sm:$0xff]   ;;  %v4474_v54 = vld [vmem:[#allocation7 + $0x2b4] ss:$8 sps:$4 sm:$0xff]  }
  0xa3   :  { %2326 = vmatprep.subr.bf16.mxu1 %v4378_v55  ;;  %v4477_v55 = vld [vmem:[#allocation7 + $0x3b4] ss:$8 sps:$4 sm:$0xff]  }
  0xa5   :  { %2284 = vmatpush2.bf16.msra.mxu0 %v4380_v56  ;;  %v4472_v56 = vld [vmem:[#allocation7 + $0x2b0] ss:$8 sps:$4 sm:$0xff]  }
  0xa6   :  { %2327 = vmatpush2.bf16.msra.mxu1 %v4381_v57  ;;  %2285 = vmatprep.subr.bf16.mxu0 %v4382_v58  ;;  %v4475_v57 = vld [vmem:[#allocation7 + $0x3b0] ss:$8 sps:$4 sm:$0xff]   ;;  %v4480_v58 = vld [vmem:[#allocation7 + $0x2a4] ss:$8 sps:$4 sm:$0xff]  }
  0xa7   :  { %2328 = vmatprep.subr.bf16.mxu1 %v4384_v59  ;;  %v4483_v59 = vld [vmem:[#allocation7 + $0x3a4] ss:$8 sps:$4 sm:$0xff]  }
  0xa9   :  { %2286 = vmatpush2.bf16.msra.mxu0 %v4386_v60  ;;  %v4478_v60 = vld [vmem:[#allocation7 + $0x2a0] ss:$8 sps:$4 sm:$0xff]  }
  0xaa   :  { %2329 = vmatpush2.bf16.msra.mxu1 %v4387_v61  ;;  %2287 = vmatprep.subr.bf16.mxu0 %v4388_v62  ;;  %v4481_v61 = vld [vmem:[#allocation7 + $0x3a0] ss:$8 sps:$4 sm:$0xff]   ;;  %v4486_v62 = vld [vmem:[#allocation7 + $0x294] ss:$8 sps:$4 sm:$0xff]  }
  0xab   :  { %2330 = vmatprep.subr.bf16.mxu1 %v4390_v63  ;;  %v4489_v63 = vld [vmem:[#allocation7 + $0x394] ss:$8 sps:$4 sm:$0xff]  }
  0xad   :  { %2288 = vmatpush2.bf16.msra.mxu0 %v4392_v0  ;;  %v4484_v0 = vld [vmem:[#allocation7 + $0x290] ss:$8 sps:$4 sm:$0xff]  }
  0xae   :  { %2331 = vmatpush2.bf16.msra.mxu1 %v4393_v1  ;;  %2343 = vmatprep.subr.bf16.mxu0 %v4402_v2  ;;  %v4487_v1 = vld [vmem:[#allocation7 + $0x390] ss:$8 sps:$4 sm:$0xff]   ;;  %v4492_v2 = vld [vmem:[#allocation7 + $0x284] ss:$8 sps:$4 sm:$0xff]  }
  0xaf   :  { %2386 = vmatprep.subr.bf16.mxu1 %v4405_v3  ;;  %v4495_v3 = vld [vmem:[#allocation7 + $0x384] ss:$8 sps:$4 sm:$0xff]  }
  0xb0   :  { %2290 = vmatmul.mubr.bf16.vlgmr.msra.gmra.mxu0 %v4394_v4  ;;  %v4490_v4 = vld [vmem:[#allocation7 + $0x280] ss:$8 sps:$4 sm:$0xff]  }
  0xb1   :  { %2333 = vmatmul.mubr.bf16.vlgmr.msra.gmra.mxu1 %v4397_v5  ;;  %2344 = vmatpush1.bf16.msra.mxu0 %v4400_v6  ;;  %v4493_v5 = vld [vmem:[#allocation7 + $0x380] ss:$8 sps:$4 sm:$0xff]   ;;  %v4504_v6 = vld [vmem:[#allocation7 + $0x474] ss:$8 sps:$4 sm:$0xff]  }
  0xb2   :  { %2387 = vmatpush1.bf16.msra.mxu1 %v4403_v7  ;;  %2345 = vmatprep.subr.bf16.mxu0 %v4408_v8  ;;  %v4507_v7 = vld [vmem:[#allocation7 + $0x574] ss:$8 sps:$4 sm:$0xff]   ;;  %v4496_v8 = vld [vmem:[#allocation2 + $0x10] ss:$84 sps:$4 sm:$0xff]  }
  0xb3   :  { %2388 = vmatprep.subr.bf16.mxu1 %v4411_v9  ;;  %2375 = vmatprep.mubr.bf16.mxu0 %v4498_v34  ;;  %v4499_v9 = vld [vmem:[#allocation2 + $0x18] ss:$84 sps:$4 sm:$0xff]   ;;  %v4540_v34 = vld [vmem:[#allocation7 + $0x414] ss:$8 sps:$4 sm:$0xff]  }
  0xb4   :  { %2418 = vmatprep.mubr.bf16.mxu1 %v4501_v35  ;;  %v4543_v35 = vld [vmem:[#allocation7 + $0x514] ss:$8 sps:$4 sm:$0xff]  }
  0xb5   :  { %2346 = vmatpush1.bf16.msra.mxu0 %v4406_v10  ;;  %v4502_v10 = vld [vmem:[#allocation7 + $0x470] ss:$8 sps:$4 sm:$0xff]  }
  0xb6   :  { %2389 = vmatpush1.bf16.msra.mxu1 %v4409_v11  ;;  %2347 = vmatprep.subr.bf16.mxu0 %v4414_v12  ;;  %v4505_v11 = vld [vmem:[#allocation7 + $0x570] ss:$8 sps:$4 sm:$0xff]   ;;  %v4510_v12 = vld [vmem:[#allocation7 + $0x464] ss:$8 sps:$4 sm:$0xff]  }
  0xb7   :  { %2390 = vmatprep.subr.bf16.mxu1 %v4417_v13  ;;  %v4513_v13 = vld [vmem:[#allocation7 + $0x564] ss:$8 sps:$4 sm:$0xff]  }
  0xb9   :  { %2348 = vmatpush1.bf16.msra.mxu0 %v4412_v14  ;;  %v4508_v14 = vld [vmem:[#allocation7 + $0x460] ss:$8 sps:$4 sm:$0xff]  }
  0xba   :  { %2391 = vmatpush1.bf16.msra.mxu1 %v4415_v15  ;;  %2349 = vmatprep.subr.bf16.mxu0 %v4420_v16  ;;  %v4511_v15 = vld [vmem:[#allocation7 + $0x560] ss:$8 sps:$4 sm:$0xff]   ;;  %v4516_v16 = vld [vmem:[#allocation7 + $0x454] ss:$8 sps:$4 sm:$0xff]  }
  0xbb   :  { %2392 = vmatprep.subr.bf16.mxu1 %v4423_v17  ;;  %v4519_v17 = vld [vmem:[#allocation7 + $0x554] ss:$8 sps:$4 sm:$0xff]  }
  0xbd   :  { %2350 = vmatpush1.bf16.msra.mxu0 %v4418_v18  ;;  %v4514_v18 = vld [vmem:[#allocation7 + $0x450] ss:$8 sps:$4 sm:$0xff]  }
  0xbe   :  { %2393 = vmatpush1.bf16.msra.mxu1 %v4421_v19  ;;  %2351 = vmatprep.subr.bf16.mxu0 %v4426_v20  ;;  %v4600_v19 = vld [vmem:[#allocation2 + $0x24] ss:$84 sps:$4 sm:$0xff]  }
  0xbf   :  { %2394 = vmatprep.subr.bf16.mxu1 %v4429_v21  ;;  %v4517_v20 = vld [vmem:[#allocation7 + $0x550] ss:$8 sps:$4 sm:$0xff]   ;;  %v4603_v21 = vld [vmem:[#allocation2 + $0x2c] ss:$84 sps:$4 sm:$0xff]  }
  0xc1   :  { %2352 = vmatpush1.bf16.msra.mxu0 %v4424_v22  ;;  %v4522_v22 = vld [vmem:[#allocation7 + $0x444] ss:$8 sps:$4 sm:$0xff]  }
  0xc2   :  { %2395 = vmatpush1.bf16.msra.mxu1 %v4427_v23  ;;  %2353 = vmatprep.subr.bf16.mxu0 %v4432_v24  ;;  %v4525_v23 = vld [vmem:[#allocation7 + $0x544] ss:$8 sps:$4 sm:$0xff]   ;;  %v4520_v24 = vld [vmem:[#allocation7 + $0x440] ss:$8 sps:$4 sm:$0xff]  }
  0xc3   :  { %2396 = vmatprep.subr.bf16.mxu1 %v4435_v25  ;;  %v4523_v25 = vld [vmem:[#allocation7 + $0x540] ss:$8 sps:$4 sm:$0xff]  }
  0xc5   :  { %2354 = vmatpush1.bf16.msra.mxu0 %v4430_v26  ;;  %v4528_v26 = vld [vmem:[#allocation7 + $0x434] ss:$8 sps:$4 sm:$0xff]  }
  0xc6   :  { %2397 = vmatpush1.bf16.msra.mxu1 %v4433_v27  ;;  %2355 = vmatprep.subr.bf16.mxu0 %v4438_v28  ;;  %v4531_v27 = vld [vmem:[#allocation7 + $0x534] ss:$8 sps:$4 sm:$0xff]   ;;  %v4526_v28 = vld [vmem:[#allocation7 + $0x430] ss:$8 sps:$4 sm:$0xff]  }
  0xc7   :  { %2398 = vmatprep.subr.bf16.mxu1 %v4441_v29  ;;  %v4529_v29 = vld [vmem:[#allocation7 + $0x530] ss:$8 sps:$4 sm:$0xff]  }
  0xc9   :  { %2356 = vmatpush1.bf16.msra.mxu0 %v4436_v30  ;;  %v4534_v30 = vld [vmem:[#allocation7 + $0x424] ss:$8 sps:$4 sm:$0xff]  }
  0xca   :  { %2399 = vmatpush1.bf16.msra.mxu1 %v4439_v31  ;;  %2357 = vmatprep.subr.bf16.mxu0 %v4444_v32  ;;  %v4537_v31 = vld [vmem:[#allocation7 + $0x524] ss:$8 sps:$4 sm:$0xff]   ;;  %v4532_v32 = vld [vmem:[#allocation7 + $0x420] ss:$8 sps:$4 sm:$0xff]  }
  0xcb   :  { %2400 = vmatprep.subr.bf16.mxu1 %v4447_v33  ;;  %v4535_v33 = vld [vmem:[#allocation7 + $0x520] ss:$8 sps:$4 sm:$0xff]  }
  0xcd   :  { %2358 = vmatpush1.bf16.msra.mxu0 %v4442_v36  ;;  %v4538_v36 = vld [vmem:[#allocation7 + $0x410] ss:$8 sps:$4 sm:$0xff]  }
  0xce   :  { %2401 = vmatpush1.bf16.msra.mxu1 %v4445_v37  ;;  %2359 = vmatprep.subr.bf16.mxu0 %v4450_v38  ;;  %v4541_v37 = vld [vmem:[#allocation7 + $0x510] ss:$8 sps:$4 sm:$0xff]   ;;  %v4546_v38 = vld [vmem:[#allocation7 + $0x404] ss:$8 sps:$4 sm:$0xff]  }
  0xcf   :  { %2402 = vmatprep.subr.bf16.mxu1 %v4453_v39  ;;  %v4549_v39 = vld [vmem:[#allocation7 + $0x504] ss:$8 sps:$4 sm:$0xff]  }
  0xd1   :  { %2360 = vmatpush2.bf16.msra.mxu0 %v4448_v40  ;;  %v4544_v40 = vld [vmem:[#allocation7 + $0x400] ss:$8 sps:$4 sm:$0xff]  }
  0xd2   :  { %2403 = vmatpush2.bf16.msra.mxu1 %v4451_v41  ;;  %2361 = vmatprep.subr.bf16.mxu0 %v4456_v42  ;;  %v4547_v41 = vld [vmem:[#allocation7 + $0x500] ss:$8 sps:$4 sm:$0xff]   ;;  %v4552_v42 = vld [vmem:[#allocation7 + $0x4f4] ss:$8 sps:$4 sm:$0xff]  }
  0xd3   :  { %2404 = vmatprep.subr.bf16.mxu1 %v4459_v43  ;;  %v4555_v43 = vld [vmem:[#allocation7 + $0x5f4] ss:$8 sps:$4 sm:$0xff]  }
  0xd5   :  { %2362 = vmatpush2.bf16.msra.mxu0 %v4454_v44  ;;  %v4550_v44 = vld [vmem:[#allocation7 + $0x4f0] ss:$8 sps:$4 sm:$0xff]  }
  0xd6   :  { %2405 = vmatpush2.bf16.msra.mxu1 %v4457_v45  ;;  %2363 = vmatprep.subr.bf16.mxu0 %v4462_v46  ;;  %v4553_v45 = vld [vmem:[#allocation7 + $0x5f0] ss:$8 sps:$4 sm:$0xff]   ;;  %v4558_v46 = vld [vmem:[#allocation7 + $0x4e4] ss:$8 sps:$4 sm:$0xff]  }
  0xd7   :  { %2406 = vmatprep.subr.bf16.mxu1 %v4465_v47  ;;  %v4561_v47 = vld [vmem:[#allocation7 + $0x5e4] ss:$8 sps:$4 sm:$0xff]  }
  0xd9   :  { %2364 = vmatpush2.bf16.msra.mxu0 %v4460_v48  ;;  %v4556_v48 = vld [vmem:[#allocation7 + $0x4e0] ss:$8 sps:$4 sm:$0xff]  }
  0xda   :  { %2407 = vmatpush2.bf16.msra.mxu1 %v4463_v49  ;;  %2365 = vmatprep.subr.bf16.mxu0 %v4468_v50  ;;  %v4559_v49 = vld [vmem:[#allocation7 + $0x5e0] ss:$8 sps:$4 sm:$0xff]   ;;  %v4564_v50 = vld [vmem:[#allocation7 + $0x4d4] ss:$8 sps:$4 sm:$0xff]  }
  0xdb   :  { %2408 = vmatprep.subr.bf16.mxu1 %v4471_v51  ;;  %v4567_v51 = vld [vmem:[#allocation7 + $0x5d4] ss:$8 sps:$4 sm:$0xff]  }
  0xdd   :  { %2366 = vmatpush2.bf16.msra.mxu0 %v4466_v52  ;;  %v4562_v52 = vld [vmem:[#allocation7 + $0x4d0] ss:$8 sps:$4 sm:$0xff]  }
  0xde   :  { %2409 = vmatpush2.bf16.msra.mxu1 %v4469_v53  ;;  %2367 = vmatprep.subr.bf16.mxu0 %v4474_v54  ;;  %v4565_v53 = vld [vmem:[#allocation7 + $0x5d0] ss:$8 sps:$4 sm:$0xff]   ;;  %v4570_v54 = vld [vmem:[#allocation7 + $0x4c4] ss:$8 sps:$4 sm:$0xff]  }
  0xdf   :  { %2410 = vmatprep.subr.bf16.mxu1 %v4477_v55  ;;  %v4573_v55 = vld [vmem:[#allocation7 + $0x5c4] ss:$8 sps:$4 sm:$0xff]  }
  0xe1   :  { %2368 = vmatpush2.bf16.msra.mxu0 %v4472_v56  ;;  %v4568_v56 = vld [vmem:[#allocation7 + $0x4c0] ss:$8 sps:$4 sm:$0xff]  }
  0xe2   :  { %2411 = vmatpush2.bf16.msra.mxu1 %v4475_v57  ;;  %2369 = vmatprep.subr.bf16.mxu0 %v4480_v58  ;;  %v4571_v57 = vld [vmem:[#allocation7 + $0x5c0] ss:$8 sps:$4 sm:$0xff]   ;;  %v4576_v58 = vld [vmem:[#allocation7 + $0x4b4] ss:$8 sps:$4 sm:$0xff]  }
  0xe3   :  { %2412 = vmatprep.subr.bf16.mxu1 %v4483_v59  ;;  %v4579_v59 = vld [vmem:[#allocation7 + $0x5b4] ss:$8 sps:$4 sm:$0xff]  }
  0xe5   :  { %2370 = vmatpush2.bf16.msra.mxu0 %v4478_v60  ;;  %v4574_v60 = vld [vmem:[#allocation7 + $0x4b0] ss:$8 sps:$4 sm:$0xff]  }
  0xe6   :  { %2413 = vmatpush2.bf16.msra.mxu1 %v4481_v61  ;;  %2371 = vmatprep.subr.bf16.mxu0 %v4486_v62  ;;  %v4577_v61 = vld [vmem:[#allocation7 + $0x5b0] ss:$8 sps:$4 sm:$0xff]   ;;  %v4582_v62 = vld [vmem:[#allocation7 + $0x4a4] ss:$8 sps:$4 sm:$0xff]  }
  0xe7   :  { %2414 = vmatprep.subr.bf16.mxu1 %v4489_v63  ;;  %v4585_v63 = vld [vmem:[#allocation7 + $0x5a4] ss:$8 sps:$4 sm:$0xff]  }
  0xe9   :  { %2372 = vmatpush2.bf16.msra.mxu0 %v4484_v0  ;;  %v4580_v0 = vld [vmem:[#allocation7 + $0x4a0] ss:$8 sps:$4 sm:$0xff]  }
  0xea   :  { %2415 = vmatpush2.bf16.msra.mxu1 %v4487_v1  ;;  %2373 = vmatprep.subr.bf16.mxu0 %v4492_v2  ;;  %v4583_v1 = vld [vmem:[#allocation7 + $0x5a0] ss:$8 sps:$4 sm:$0xff]   ;;  %v4588_v2 = vld [vmem:[#allocation7 + $0x494] ss:$8 sps:$4 sm:$0xff]  }
  0xeb   :  { %2416 = vmatprep.subr.bf16.mxu1 %v4495_v3  ;;  %v4591_v3 = vld [vmem:[#allocation7 + $0x594] ss:$8 sps:$4 sm:$0xff]  }
  0xed   :  { %2374 = vmatpush2.bf16.msra.mxu0 %v4490_v4  ;;  %v4586_v4 = vld [vmem:[#allocation7 + $0x490] ss:$8 sps:$4 sm:$0xff]  }
  0xee   :  { %2417 = vmatpush2.bf16.msra.mxu1 %v4493_v5  ;;  %2429 = vmatprep.subr.bf16.mxu0 %v4504_v6  ;;  %v4589_v5 = vld [vmem:[#allocation7 + $0x590] ss:$8 sps:$4 sm:$0xff]   ;;  %v4594_v6 = vld [vmem:[#allocation7 + $0x484] ss:$8 sps:$4 sm:$0xff]  }
  0xef   :  { %2472 = vmatprep.subr.bf16.mxu1 %v4507_v7  ;;  %v4597_v7 = vld [vmem:[#allocation7 + $0x584] ss:$8 sps:$4 sm:$0xff]  }
  0xf0   :  { %2376 = vmatmul.mubr.bf16.vlgmr.msra.gmra.mxu0 %v4496_v8  ;;  %v4592_v8 = vld [vmem:[#allocation7 + $0x480] ss:$8 sps:$4 sm:$0xff]  }
  0xf1   :  { %2419 = vmatmul.mubr.bf16.vlgmr.msra.gmra.mxu1 %v4499_v9  ;;  %2430 = vmatpush1.bf16.msra.mxu0 %v4502_v10  ;;  %v4595_v9 = vld [vmem:[#allocation7 + $0x580] ss:$8 sps:$4 sm:$0xff]   ;;  %v4606_v10 = vld [vmem:[#allocation7 + $0x674] ss:$8 sps:$4 sm:$0xff]  }
  0xf2   :  { %2473 = vmatpush1.bf16.msra.mxu1 %v4505_v11  ;;  %2431 = vmatprep.subr.bf16.mxu0 %v4510_v12  ;;  %v4609_v11 = vld [vmem:[#allocation7 + $0x774] ss:$8 sps:$4 sm:$0xff]  }
  0xf3   :  { %2474 = vmatprep.subr.bf16.mxu1 %v4513_v13  ;;  %2461 = vmatprep.mubr.bf16.mxu0 %v4600_v19  ;;  %v4598_v12 = vld [vmem:[#allocation2 + $0x20] ss:$84 sps:$4 sm:$0xff]   ;;  %v4601_v13 = vld [vmem:[#allocation2 + $0x28] ss:$84 sps:$4 sm:$0xff]  }
  0xf4   :  { %2504 = vmatprep.mubr.bf16.mxu1 %v4603_v21  ;;  %v4705_v19 = vld [vmem:[#allocation2 + $0x3c] ss:$84 sps:$4 sm:$0xff]   ;;  %v4613_v21 = vld [vmem:[#allocation7 + $0x760] ss:$8 sps:$4 sm:$0xff]  }
  0xf5   :  { %2432 = vmatpush1.bf16.msra.mxu0 %v4508_v14  ;;  %v4604_v14 = vld [vmem:[#allocation7 + $0x670] ss:$8 sps:$4 sm:$0xff]  }
  0xf6   :  { %2475 = vmatpush1.bf16.msra.mxu1 %v4511_v15  ;;  %2433 = vmatprep.subr.bf16.mxu0 %v4516_v16  ;;  %v4607_v15 = vld [vmem:[#allocation7 + $0x770] ss:$8 sps:$4 sm:$0xff]   ;;  %v4612_v16 = vld [vmem:[#allocation7 + $0x664] ss:$8 sps:$4 sm:$0xff]  }
  0xf7   :  { %2476 = vmatprep.subr.bf16.mxu1 %v4519_v17  ;;  %v4615_v17 = vld [vmem:[#allocation7 + $0x764] ss:$8 sps:$4 sm:$0xff]  }
  0xf9   :  { %2434 = vmatpush1.bf16.msra.mxu0 %v4514_v18  ;;  %v4702_v18 = vld [vmem:[#allocation2 + $0x34] ss:$84 sps:$4 sm:$0xff]  }
  0xfa   :  { %2477 = vmatpush1.bf16.msra.mxu1 %v4517_v20  ;;  %2435 = vmatprep.subr.bf16.mxu0 %v4522_v22  ;;  %v4610_v20 = vld [vmem:[#allocation7 + $0x660] ss:$8 sps:$4 sm:$0xff]   ;;  %v4618_v22 = vld [vmem:[#allocation7 + $0x654] ss:$8 sps:$4 sm:$0xff]  }
  0xfb   :  { %2478 = vmatprep.subr.bf16.mxu1 %v4525_v23  ;;  %v4621_v23 = vld [vmem:[#allocation7 + $0x754] ss:$8 sps:$4 sm:$0xff]  }
  0xfd   :  { %2436 = vmatpush1.bf16.msra.mxu0 %v4520_v24  ;;  %v4616_v24 = vld [vmem:[#allocation7 + $0x650] ss:$8 sps:$4 sm:$0xff]  }
  0xfe   :  { %2479 = vmatpush1.bf16.msra.mxu1 %v4523_v25  ;;  %2437 = vmatprep.subr.bf16.mxu0 %v4528_v26  ;;  %v4619_v25 = vld [vmem:[#allocation7 + $0x750] ss:$8 sps:$4 sm:$0xff]   ;;  %v4624_v26 = vld [vmem:[#allocation7 + $0x644] ss:$8 sps:$4 sm:$0xff]  }
  0xff   :  { %2480 = vmatprep.subr.bf16.mxu1 %v4531_v27  ;;  %v4627_v27 = vld [vmem:[#allocation7 + $0x744] ss:$8 sps:$4 sm:$0xff]  }
 0x101   :  { %2438 = vmatpush1.bf16.msra.mxu0 %v4526_v28  ;;  %v4622_v28 = vld [vmem:[#allocation7 + $0x640] ss:$8 sps:$4 sm:$0xff]  }
 0x102   :  { %2481 = vmatpush1.bf16.msra.mxu1 %v4529_v29  ;;  %2439 = vmatprep.subr.bf16.mxu0 %v4534_v30  ;;  %v4625_v29 = vld [vmem:[#allocation7 + $0x740] ss:$8 sps:$4 sm:$0xff]   ;;  %v4630_v30 = vld [vmem:[#allocation7 + $0x634] ss:$8 sps:$4 sm:$0xff]  }
 0x103   :  { %2482 = vmatprep.subr.bf16.mxu1 %v4537_v31  ;;  %v4633_v31 = vld [vmem:[#allocation7 + $0x734] ss:$8 sps:$4 sm:$0xff]  }
 0x105   :  { %2440 = vmatpush1.bf16.msra.mxu0 %v4532_v32  ;;  %v5211_v32 = vmov 0  }
 0x106   :  { %2483 = vmatpush1.bf16.msra.mxu1 %v4535_v33  ;;  %2441 = vmatprep.subr.bf16.mxu0 %v4540_v34  ;;  %v4628_v33 = vld [vmem:[#allocation7 + $0x630] ss:$8 sps:$4 sm:$0xff]  }
 0x107   :  { %2484 = vmatprep.subr.bf16.mxu1 %v4543_v35  ;;  %4297 = vset.pattern.permute.xlu0 %v5211_v32  ;;  %v4631_v34 = vld [vmem:[#allocation7 + $0x730] ss:$8 sps:$4 sm:$0xff]   ;;  %v4636_v35 = vld [vmem:[#allocation7 + $0x624] ss:$8 sps:$4 sm:$0xff]  }
 0x109   :  { %2442 = vmatpush1.bf16.msra.mxu0 %v4538_v36  ;;  %v4639_v36 = vld [vmem:[#allocation7 + $0x724] ss:$8 sps:$4 sm:$0xff]  }
 0x10a   :  { %2485 = vmatpush1.bf16.msra.mxu1 %v4541_v37  ;;  %2443 = vmatprep.subr.bf16.mxu0 %v4546_v38  ;;  %v4634_v37 = vld [vmem:[#allocation7 + $0x620] ss:$8 sps:$4 sm:$0xff]  }
 0x10b   :  { %2486 = vmatprep.subr.bf16.mxu1 %v4549_v39  ;;  %v4637_v38 = vld [vmem:[#allocation7 + $0x720] ss:$8 sps:$4 sm:$0xff]   ;;  %v4642_v39 = vld [vmem:[#allocation7 + $0x614] ss:$8 sps:$4 sm:$0xff]  }
 0x10d   :  { %2444 = vmatpush1.bf16.msra.mxu0 %v4544_v40  ;;  %v4645_v40 = vld [vmem:[#allocation7 + $0x714] ss:$8 sps:$4 sm:$0xff]  }
 0x10e   :  { %2487 = vmatpush1.bf16.msra.mxu1 %v4547_v41  ;;  %2445 = vmatprep.subr.bf16.mxu0 %v4552_v42  ;;  %v4640_v41 = vld [vmem:[#allocation7 + $0x610] ss:$8 sps:$4 sm:$0xff]  }
 0x10f   :  { %2488 = vmatprep.subr.bf16.mxu1 %v4555_v43  ;;  %v4643_v42 = vld [vmem:[#allocation7 + $0x710] ss:$8 sps:$4 sm:$0xff]   ;;  %v4648_v43 = vld [vmem:[#allocation7 + $0x604] ss:$8 sps:$4 sm:$0xff]  }
 0x111   :  { %2446 = vmatpush2.bf16.msra.mxu0 %v4550_v44  ;;  %v4651_v44 = vld [vmem:[#allocation7 + $0x704] ss:$8 sps:$4 sm:$0xff]  }
 0x112   :  { %2489 = vmatpush2.bf16.msra.mxu1 %v4553_v45  ;;  %2447 = vmatprep.subr.bf16.mxu0 %v4558_v46  ;;  %v4646_v45 = vld [vmem:[#allocation7 + $0x600] ss:$8 sps:$4 sm:$0xff]  }
 0x113   :  { %2490 = vmatprep.subr.bf16.mxu1 %v4561_v47  ;;  %v4649_v46 = vld [vmem:[#allocation7 + $0x700] ss:$8 sps:$4 sm:$0xff]   ;;  %v4654_v47 = vld [vmem:[#allocation7 + $0x6f4] ss:$8 sps:$4 sm:$0xff]  }
 0x115   :  { %2448 = vmatpush2.bf16.msra.mxu0 %v4556_v48  ;;  %v4657_v48 = vld [vmem:[#allocation7 + $0x7f4] ss:$8 sps:$4 sm:$0xff]  }
 0x116   :  { %2491 = vmatpush2.bf16.msra.mxu1 %v4559_v49  ;;  %2449 = vmatprep.subr.bf16.mxu0 %v4564_v50  ;;  %v4652_v49 = vld [vmem:[#allocation7 + $0x6f0] ss:$8 sps:$4 sm:$0xff]  }
 0x117   :  { %2492 = vmatprep.subr.bf16.mxu1 %v4567_v51  ;;  %v4655_v50 = vld [vmem:[#allocation7 + $0x7f0] ss:$8 sps:$4 sm:$0xff]   ;;  %v4660_v51 = vld [vmem:[#allocation7 + $0x6e4] ss:$8 sps:$4 sm:$0xff]  }
 0x119   :  { %2450 = vmatpush2.bf16.msra.mxu0 %v4562_v52  ;;  %v4663_v52 = vld [vmem:[#allocation7 + $0x7e4] ss:$8 sps:$4 sm:$0xff]  }
 0x11a   :  { %2493 = vmatpush2.bf16.msra.mxu1 %v4565_v53  ;;  %2451 = vmatprep.subr.bf16.mxu0 %v4570_v54  ;;  %v4658_v53 = vld [vmem:[#allocation7 + $0x6e0] ss:$8 sps:$4 sm:$0xff]  }
 0x11b   :  { %2494 = vmatprep.subr.bf16.mxu1 %v4573_v55  ;;  %v4661_v54 = vld [vmem:[#allocation7 + $0x7e0] ss:$8 sps:$4 sm:$0xff]   ;;  %v4666_v55 = vld [vmem:[#allocation7 + $0x6d4] ss:$8 sps:$4 sm:$0xff]  }
 0x11d   :  { %2452 = vmatpush2.bf16.msra.mxu0 %v4568_v56  ;;  %v4669_v56 = vld [vmem:[#allocation7 + $0x7d4] ss:$8 sps:$4 sm:$0xff]  }
 0x11e   :  { %2495 = vmatpush2.bf16.msra.mxu1 %v4571_v57  ;;  %2453 = vmatprep.subr.bf16.mxu0 %v4576_v58  ;;  %v4664_v57 = vld [vmem:[#allocation7 + $0x6d0] ss:$8 sps:$4 sm:$0xff]  }
 0x11f   :  { %2496 = vmatprep.subr.bf16.mxu1 %v4579_v59  ;;  %v4667_v58 = vld [vmem:[#allocation7 + $0x7d0] ss:$8 sps:$4 sm:$0xff]   ;;  %v4672_v59 = vld [vmem:[#allocation7 + $0x6c4] ss:$8 sps:$4 sm:$0xff]  }
 0x121   :  { %2454 = vmatpush2.bf16.msra.mxu0 %v4574_v60  ;;  %v4675_v60 = vld [vmem:[#allocation7 + $0x7c4] ss:$8 sps:$4 sm:$0xff]  }
 0x122   :  { %2497 = vmatpush2.bf16.msra.mxu1 %v4577_v61  ;;  %2455 = vmatprep.subr.bf16.mxu0 %v4582_v62  ;;  %v4670_v61 = vld [vmem:[#allocation7 + $0x6c0] ss:$8 sps:$4 sm:$0xff]  }
 0x123   :  { %2498 = vmatprep.subr.bf16.mxu1 %v4585_v63  ;;  %v4673_v62 = vld [vmem:[#allocation7 + $0x7c0] ss:$8 sps:$4 sm:$0xff]   ;;  %v4678_v63 = vld [vmem:[#allocation7 + $0x6b4] ss:$8 sps:$4 sm:$0xff]  }
 0x125   :  { %2456 = vmatpush2.bf16.msra.mxu0 %v4580_v0  ;;  %v4681_v0 = vld [vmem:[#allocation7 + $0x7b4] ss:$8 sps:$4 sm:$0xff]  }
 0x126   :  { %2499 = vmatpush2.bf16.msra.mxu1 %v4583_v1  ;;  %2457 = vmatprep.subr.bf16.mxu0 %v4588_v2  ;;  %v4676_v1 = vld [vmem:[#allocation7 + $0x6b0] ss:$8 sps:$4 sm:$0xff]  }
 0x127   :  { %2500 = vmatprep.subr.bf16.mxu1 %v4591_v3  ;;  %v4679_v2 = vld [vmem:[#allocation7 + $0x7b0] ss:$8 sps:$4 sm:$0xff]   ;;  %v4684_v3 = vld [vmem:[#allocation7 + $0x6a4] ss:$8 sps:$4 sm:$0xff]  }
 0x129   :  { %2458 = vmatpush2.bf16.msra.mxu0 %v4586_v4  ;;  %v4687_v4 = vld [vmem:[#allocation7 + $0x7a4] ss:$8 sps:$4 sm:$0xff]  }
 0x12a   :  { %2501 = vmatpush2.bf16.msra.mxu1 %v4589_v5  ;;  %2459 = vmatprep.subr.bf16.mxu0 %v4594_v6  ;;  %v4682_v5 = vld [vmem:[#allocation7 + $0x6a0] ss:$8 sps:$4 sm:$0xff]  }
 0x12b   :  { %2502 = vmatprep.subr.bf16.mxu1 %v4597_v7  ;;  %v4685_v6 = vld [vmem:[#allocation7 + $0x7a0] ss:$8 sps:$4 sm:$0xff]   ;;  %v4690_v7 = vld [vmem:[#allocation7 + $0x694] ss:$8 sps:$4 sm:$0xff]  }
 0x12d   :  { %2460 = vmatpush2.bf16.msra.mxu0 %v4592_v8  ;;  %v4693_v8 = vld [vmem:[#allocation7 + $0x794] ss:$8 sps:$4 sm:$0xff]  }
 0x12e   :  { %2503 = vmatpush2.bf16.msra.mxu1 %v4595_v9  ;;  %2515 = vmatprep.subr.bf16.mxu0 %v4606_v10  ;;  %v4688_v9 = vld [vmem:[#allocation7 + $0x690] ss:$8 sps:$4 sm:$0xff]  }
 0x12f   :  { %2558 = vmatprep.subr.bf16.mxu1 %v4609_v11  ;;  %v4691_v10 = vld [vmem:[#allocation7 + $0x790] ss:$8 sps:$4 sm:$0xff]   ;;  %v4696_v11 = vld [vmem:[#allocation7 + $0x684] ss:$8 sps:$4 sm:$0xff]  }
 0x130   :  { %2462 = vmatmul.mubr.bf16.vlgmr.msra.gmra.mxu0 %v4598_v12  ;;  %v4699_v12 = vld [vmem:[#allocation7 + $0x784] ss:$8 sps:$4 sm:$0xff]  }
 0x131   :  { %2505 = vmatmul.mubr.bf16.vlgmr.msra.gmra.mxu1 %v4601_v13  ;;  %2516 = vmatpush1.bf16.msra.mxu0 %v4604_v14  ;;  %v4694_v13 = vld [vmem:[#allocation7 + $0x680] ss:$8 sps:$4 sm:$0xff]  }
 0x132   :  { %2559 = vmatpush1.bf16.msra.mxu1 %v4607_v15  ;;  %2517 = vmatprep.subr.bf16.mxu0 %v4612_v16  ;;  %v4697_v14 = vld [vmem:[#allocation7 + $0x780] ss:$8 sps:$4 sm:$0xff]   ;;  %v4700_v15 = vld [vmem:[#allocation2 + $0x30] ss:$84 sps:$4 sm:$0xff]   ;;  %v4708_v16 = vld [vmem:[#allocation7 + $0x874] ss:$8 sps:$4 sm:$0xff]  }
 0x133   :  { %2560 = vmatprep.subr.bf16.mxu1 %v4615_v17  ;;  %2547 = vmatprep.mubr.bf16.mxu0 %v4702_v18  ;;  %v4711_v17 = vld [vmem:[#allocation7 + $0x974] ss:$8 sps:$4 sm:$0xff]   ;;  %v4703_v18 = vld [vmem:[#allocation2 + $0x38] ss:$84 sps:$4 sm:$0xff]  }
 0x134   :  { %2590 = vmatprep.mubr.bf16.mxu1 %v4705_v19  ;;  %v4706_v19 = vld [vmem:[#allocation7 + $0x870] ss:$8 sps:$4 sm:$0xff]  }
 0x135   :  { %2518 = vmatpush1.bf16.msra.mxu0 %v4610_v20  ;;  %v4709_v20 = vld [vmem:[#allocation7 + $0x970] ss:$8 sps:$4 sm:$0xff]  }
 0x136   :  { %2561 = vmatpush1.bf16.msra.mxu1 %v4613_v21  ;;  %2519 = vmatprep.subr.bf16.mxu0 %v4618_v22  ;;  %v4714_v21 = vld [vmem:[#allocation7 + $0x864] ss:$8 sps:$4 sm:$0xff]  }
 0x137   :  { %2562 = vmatprep.subr.bf16.mxu1 %v4621_v23  ;;  %v4717_v22 = vld [vmem:[#allocation7 + $0x964] ss:$8 sps:$4 sm:$0xff]   ;;  %v4712_v23 = vld [vmem:[#allocation7 + $0x860] ss:$8 sps:$4 sm:$0xff]  }
 0x139   :  { %2520 = vmatpush1.bf16.msra.mxu0 %v4616_v24  ;;  %v4715_v24 = vld [vmem:[#allocation7 + $0x960] ss:$8 sps:$4 sm:$0xff]  }
 0x13a   :  { %2563 = vmatpush1.bf16.msra.mxu1 %v4619_v25  ;;  %2521 = vmatprep.subr.bf16.mxu0 %v4624_v26  ;;  %v4804_v25 = vld [vmem:[#allocation2 + $0x44] ss:$84 sps:$4 sm:$0xff]   ;;  %v4807_v26 = vld [vmem:[#allocation2 + $0x4c] ss:$84 sps:$4 sm:$0xff]  }
 0x13b   :  { %2564 = vmatprep.subr.bf16.mxu1 %v4627_v27  ;;  %v4720_v27 = vld [vmem:[#allocation7 + $0x854] ss:$8 sps:$4 sm:$0xff]  }
 0x13d   :  { %2522 = vmatpush1.bf16.msra.mxu0 %v4622_v28  ;;  %v4723_v28 = vld [vmem:[#allocation7 + $0x954] ss:$8 sps:$4 sm:$0xff]  }
 0x13e   :  { %2565 = vmatpush1.bf16.msra.mxu1 %v4625_v29  ;;  %2523 = vmatprep.subr.bf16.mxu0 %v4630_v30  ;;  %v4718_v29 = vld [vmem:[#allocation7 + $0x850] ss:$8 sps:$4 sm:$0xff]  }
 0x13f   :  { %2566 = vmatprep.subr.bf16.mxu1 %v4633_v31  ;;  %v4721_v30 = vld [vmem:[#allocation7 + $0x950] ss:$8 sps:$4 sm:$0xff]   ;;  %v4726_v31 = vld [vmem:[#allocation7 + $0x844] ss:$8 sps:$4 sm:$0xff]  }
 0x141   :  { %2524 = vmatpush1.bf16.msra.mxu0 %v4628_v33  ;;  %v4729_v33 = vld [vmem:[#allocation7 + $0x944] ss:$8 sps:$4 sm:$0xff]  }
 0x142   :  { %2567 = vmatpush1.bf16.msra.mxu1 %v4631_v34  ;;  %2525 = vmatprep.subr.bf16.mxu0 %v4636_v35  ;;  %v4724_v34 = vld [vmem:[#allocation7 + $0x840] ss:$8 sps:$4 sm:$0xff]  }
 0x143   :  { %2568 = vmatprep.subr.bf16.mxu1 %v4639_v36  ;;  %v4727_v35 = vld [vmem:[#allocation7 + $0x940] ss:$8 sps:$4 sm:$0xff]   ;;  %v4732_v36 = vld [vmem:[#allocation7 + $0x834] ss:$8 sps:$4 sm:$0xff]  }
 0x145   :  { %2526 = vmatpush1.bf16.msra.mxu0 %v4634_v37  ;;  %v4735_v37 = vld [vmem:[#allocation7 + $0x934] ss:$8 sps:$4 sm:$0xff]  }
 0x146   :  { %2569 = vmatpush1.bf16.msra.mxu1 %v4637_v38  ;;  %2527 = vmatprep.subr.bf16.mxu0 %v4642_v39  ;;  %v4730_v38 = vld [vmem:[#allocation7 + $0x830] ss:$8 sps:$4 sm:$0xff]  }
 0x147   :  { %2570 = vmatprep.subr.bf16.mxu1 %v4645_v40  ;;  %v4733_v39 = vld [vmem:[#allocation7 + $0x930] ss:$8 sps:$4 sm:$0xff]   ;;  %v4738_v40 = vld [vmem:[#allocation7 + $0x824] ss:$8 sps:$4 sm:$0xff]  }
 0x149   :  { %2528 = vmatpush1.bf16.msra.mxu0 %v4640_v41  ;;  %v4741_v41 = vld [vmem:[#allocation7 + $0x924] ss:$8 sps:$4 sm:$0xff]  }
 0x14a   :  { %2571 = vmatpush1.bf16.msra.mxu1 %v4643_v42  ;;  %2529 = vmatprep.subr.bf16.mxu0 %v4648_v43  ;;  %v4736_v42 = vld [vmem:[#allocation7 + $0x820] ss:$8 sps:$4 sm:$0xff]  }
 0x14b   :  { %2572 = vmatprep.subr.bf16.mxu1 %v4651_v44  ;;  %v4739_v43 = vld [vmem:[#allocation7 + $0x920] ss:$8 sps:$4 sm:$0xff]   ;;  %v4744_v44 = vld [vmem:[#allocation7 + $0x814] ss:$8 sps:$4 sm:$0xff]  }
 0x14d   :  { %2530 = vmatpush1.bf16.msra.mxu0 %v4646_v45  ;;  %v4747_v45 = vld [vmem:[#allocation7 + $0x914] ss:$8 sps:$4 sm:$0xff]  }
 0x14e   :  { %2573 = vmatpush1.bf16.msra.mxu1 %v4649_v46  ;;  %2531 = vmatprep.subr.bf16.mxu0 %v4654_v47  ;;  %v4742_v46 = vld [vmem:[#allocation7 + $0x810] ss:$8 sps:$4 sm:$0xff]  }
 0x14f   :  { %2574 = vmatprep.subr.bf16.mxu1 %v4657_v48  ;;  %v4745_v47 = vld [vmem:[#allocation7 + $0x910] ss:$8 sps:$4 sm:$0xff]   ;;  %v4750_v48 = vld [vmem:[#allocation7 + $0x804] ss:$8 sps:$4 sm:$0xff]  }
 0x151   :  { %2532 = vmatpush2.bf16.msra.mxu0 %v4652_v49  ;;  %v4753_v49 = vld [vmem:[#allocation7 + $0x904] ss:$8 sps:$4 sm:$0xff]  }
 0x152   :  { %2575 = vmatpush2.bf16.msra.mxu1 %v4655_v50  ;;  %2533 = vmatprep.subr.bf16.mxu0 %v4660_v51  ;;  %v4748_v50 = vld [vmem:[#allocation7 + $0x800] ss:$8 sps:$4 sm:$0xff]  }
 0x153   :  { %2576 = vmatprep.subr.bf16.mxu1 %v4663_v52  ;;  %v4751_v51 = vld [vmem:[#allocation7 + $0x900] ss:$8 sps:$4 sm:$0xff]   ;;  %v4756_v52 = vld [vmem:[#allocation7 + $0x8f4] ss:$8 sps:$4 sm:$0xff]  }
 0x155   :  { %2534 = vmatpush2.bf16.msra.mxu0 %v4658_v53  ;;  %v4759_v53 = vld [vmem:[#allocation7 + $0x9f4] ss:$8 sps:$4 sm:$0xff]  }
 0x156   :  { %2577 = vmatpush2.bf16.msra.mxu1 %v4661_v54  ;;  %2535 = vmatprep.subr.bf16.mxu0 %v4666_v55  ;;  %v4754_v54 = vld [vmem:[#allocation7 + $0x8f0] ss:$8 sps:$4 sm:$0xff]  }
 0x157   :  { %2578 = vmatprep.subr.bf16.mxu1 %v4669_v56  ;;  %v4757_v55 = vld [vmem:[#allocation7 + $0x9f0] ss:$8 sps:$4 sm:$0xff]   ;;  %v4762_v56 = vld [vmem:[#allocation7 + $0x8e4] ss:$8 sps:$4 sm:$0xff]  }
 0x159   :  { %2536 = vmatpush2.bf16.msra.mxu0 %v4664_v57  ;;  %v4765_v57 = vld [vmem:[#allocation7 + $0x9e4] ss:$8 sps:$4 sm:$0xff]  }
 0x15a   :  { %2579 = vmatpush2.bf16.msra.mxu1 %v4667_v58  ;;  %2537 = vmatprep.subr.bf16.mxu0 %v4672_v59  ;;  %v4760_v58 = vld [vmem:[#allocation7 + $0x8e0] ss:$8 sps:$4 sm:$0xff]  }
 0x15b   :  { %2580 = vmatprep.subr.bf16.mxu1 %v4675_v60  ;;  %v4763_v59 = vld [vmem:[#allocation7 + $0x9e0] ss:$8 sps:$4 sm:$0xff]   ;;  %v4768_v60 = vld [vmem:[#allocation7 + $0x8d4] ss:$8 sps:$4 sm:$0xff]  }
 0x15d   :  { %2538 = vmatpush2.bf16.msra.mxu0 %v4670_v61  ;;  %v4771_v61 = vld [vmem:[#allocation7 + $0x9d4] ss:$8 sps:$4 sm:$0xff]  }
 0x15e   :  { %2581 = vmatpush2.bf16.msra.mxu1 %v4673_v62  ;;  %2539 = vmatprep.subr.bf16.mxu0 %v4678_v63  ;;  %v4766_v62 = vld [vmem:[#allocation7 + $0x8d0] ss:$8 sps:$4 sm:$0xff]  }
 0x15f   :  { %2582 = vmatprep.subr.bf16.mxu1 %v4681_v0  ;;  %v4769_v63 = vld [vmem:[#allocation7 + $0x9d0] ss:$8 sps:$4 sm:$0xff]   ;;  %v4774_v0 = vld [vmem:[#allocation7 + $0x8c4] ss:$8 sps:$4 sm:$0xff]  }
 0x161   :  { %2540 = vmatpush2.bf16.msra.mxu0 %v4676_v1  ;;  %v4777_v1 = vld [vmem:[#allocation7 + $0x9c4] ss:$8 sps:$4 sm:$0xff]  }
 0x162   :  { %2583 = vmatpush2.bf16.msra.mxu1 %v4679_v2  ;;  %2541 = vmatprep.subr.bf16.mxu0 %v4684_v3  ;;  %v4772_v2 = vld [vmem:[#allocation7 + $0x8c0] ss:$8 sps:$4 sm:$0xff]  }
 0x163   :  { %2584 = vmatprep.subr.bf16.mxu1 %v4687_v4  ;;  %v4775_v3 = vld [vmem:[#allocation7 + $0x9c0] ss:$8 sps:$4 sm:$0xff]   ;;  %v4780_v4 = vld [vmem:[#allocation7 + $0x8b4] ss:$8 sps:$4 sm:$0xff]  }
 0x165   :  { %2542 = vmatpush2.bf16.msra.mxu0 %v4682_v5  ;;  %v4783_v5 = vld [vmem:[#allocation7 + $0x9b4] ss:$8 sps:$4 sm:$0xff]  }
 0x166   :  { %2585 = vmatpush2.bf16.msra.mxu1 %v4685_v6  ;;  %2543 = vmatprep.subr.bf16.mxu0 %v4690_v7  ;;  %v4778_v6 = vld [vmem:[#allocation7 + $0x8b0] ss:$8 sps:$4 sm:$0xff]  }
 0x167   :  { %2586 = vmatprep.subr.bf16.mxu1 %v4693_v8  ;;  %v4781_v7 = vld [vmem:[#allocation7 + $0x9b0] ss:$8 sps:$4 sm:$0xff]   ;;  %v4786_v8 = vld [vmem:[#allocation7 + $0x8a4] ss:$8 sps:$4 sm:$0xff]  }
 0x169   :  { %2544 = vmatpush2.bf16.msra.mxu0 %v4688_v9  ;;  %v4789_v9 = vld [vmem:[#allocation7 + $0x9a4] ss:$8 sps:$4 sm:$0xff]  }
 0x16a   :  { %2587 = vmatpush2.bf16.msra.mxu1 %v4691_v10  ;;  %2545 = vmatprep.subr.bf16.mxu0 %v4696_v11  ;;  %v4784_v10 = vld [vmem:[#allocation7 + $0x8a0] ss:$8 sps:$4 sm:$0xff]  }
 0x16b   :  { %2588 = vmatprep.subr.bf16.mxu1 %v4699_v12  ;;  %v4787_v11 = vld [vmem:[#allocation7 + $0x9a0] ss:$8 sps:$4 sm:$0xff]   ;;  %v4792_v12 = vld [vmem:[#allocation7 + $0x894] ss:$8 sps:$4 sm:$0xff]  }
 0x16d   :  { %2546 = vmatpush2.bf16.msra.mxu0 %v4694_v13  ;;  %v4795_v13 = vld [vmem:[#allocation7 + $0x994] ss:$8 sps:$4 sm:$0xff]  }
 0x16e   :  { %2589 = vmatpush2.bf16.msra.mxu1 %v4697_v14  ;;  %2601 = vmatprep.subr.bf16.mxu0 %v4708_v16  ;;  %v4790_v14 = vld [vmem:[#allocation7 + $0x890] ss:$8 sps:$4 sm:$0xff]   ;;  %v4798_v16 = vld [vmem:[#allocation7 + $0x884] ss:$8 sps:$4 sm:$0xff]  }
 0x16f   :  { %2644 = vmatprep.subr.bf16.mxu1 %v4711_v17  ;;  %v4801_v17 = vld [vmem:[#allocation7 + $0x984] ss:$8 sps:$4 sm:$0xff]  }
 0x170   :  { %2548 = vmatmul.mubr.bf16.vlgmr.msra.gmra.mxu0 %v4700_v15  ;;  %v4793_v15 = vld [vmem:[#allocation7 + $0x990] ss:$8 sps:$4 sm:$0xff]  }
 0x171   :  { %2591 = vmatmul.mubr.bf16.vlgmr.msra.gmra.mxu1 %v4703_v18  ;;  %2602 = vmatpush1.bf16.msra.mxu0 %v4706_v19  ;;  %v503_v18 = vld [vmem:[#allocation7 + $0xa20] sm:$0xff] }
 0x172   :  { %2645 = vmatpush1.bf16.msra.mxu1 %v4709_v20  ;;  %2603 = vmatprep.subr.bf16.mxu0 %v4714_v21  ;;  %v4796_v19 = vld [vmem:[#allocation7 + $0x880] ss:$8 sps:$4 sm:$0xff]   ;;  %v4135_v21 = vcombine.high %v503_v18, %v503_v18 }
 0x173   :  { %2646 = vmatprep.subr.bf16.mxu1 %v4717_v22  ;;  %2633 = vmatprep.mubr.bf16.mxu0 %v4804_v25  ;;  %v4799_v20 = vld [vmem:[#allocation7 + $0x980] ss:$8 sps:$4 sm:$0xff]   ;;  %v4811_v22 = vld [vmem:[%s5517_s5 + $0x74] ss:$8 sps:$4 sm:$0xff]  }
 0x174   :  { %2676 = vmatprep.mubr.bf16.mxu1 %v4807_v26  ;;  %v4805_v25 = vld [vmem:[#allocation2 + $0x48] ss:$84 sps:$4 sm:$0xff]   ;;  %v4809_v26 = vld [vmem:[%s5517_s5 + $0x70] ss:$8 sps:$4 sm:$0xff]  }
 0x175   :  { %2604 = vmatpush1.bf16.msra.mxu0 %v4712_v23  ;;  %v4134_v23 = vcombine.low %v503_v18, %v503_v18  ;;  %v4880_v18 = vld [vmem:[#allocation11 + $0x70] ss:$8 sps:$4 sm:$0xff]  }
 0x176   :  { %2647 = vmatpush1.bf16.msra.mxu1 %v4715_v24  ;;  %2605 = vmatprep.subr.bf16.mxu0 %v4720_v27  ;;  %v4802_v24 = vld [vmem:[#allocation2 + $0x40] ss:$84 sps:$4 sm:$0xff]  }
 0x177   :  { %2648 = vmatprep.subr.bf16.mxu1 %v4723_v28  ;;  %v2252_v27 = vsel %vm2250_vm0, %v4134_v23, 0  ;;  %v4815_v28 = vld [vmem:[#allocation7 + $0xa14] ss:$8 sps:$4 sm:$0xff]   ;;  %v4891_v23 = vld [vmem:[#allocation11 + $0x44] ss:$8 sps:$4 sm:$0xff]  }
 0x179   :  { %2606 = vmatpush1.bf16.msra.mxu0 %v4718_v29  ;;  %v4818_v29 = vld [vmem:[%s5517_s5 + $0x64] ss:$8 sps:$4 sm:$0xff]  }
 0x17a   :  { %2649 = vmatpush1.bf16.msra.mxu1 %v4721_v30  ;;  %2607 = vmatprep.subr.bf16.mxu0 %v4726_v31  ;;  %v2776_v30 = vld [vmem:[%s5517_s5 + $0x130] sm:$0x33]  ;;  %v4879_v31 = vld [vmem:[#allocation5 + $0x4] ss:$12 sps:$4 sm:$0xff]  }
 0x17b   :  { %2650 = vmatprep.subr.bf16.mxu1 %v4729_v33  ;;  %v5212_v33 = vmov 65535  }
 0x17d   :  { %2608 = vmatpush1.bf16.msra.mxu0 %v4724_v34  ;;  %v3005_v34 = vsel %vm3003_vm1, 4294967295, %v5212_v33  ;;  %v4901_v33 = vld [vmem:[#allocation11] ss:$8 sps:$4 sm:$0xff]  }
 0x17e   :  { %2651 = vmatpush1.bf16.msra.mxu1 %v4727_v35  ;;  %2609 = vmatprep.subr.bf16.mxu0 %v4732_v36  ;;  %v4813_v35 = vld [vmem:[#allocation7 + $0xa10] ss:$8 sps:$4 sm:$0xff]   ;;  %v4816_v36 = vld [vmem:[%s5517_s5 + $0x60] ss:$8 sps:$4 sm:$0xff]  }
 0x17f   :  { %2652 = vmatprep.subr.bf16.mxu1 %v4735_v37  ;;  %v4821_v37 = vld [vmem:[#allocation7 + $0xa04] ss:$8 sps:$4 sm:$0xff]  }
 0x181   :  { %2610 = vmatpush1.bf16.msra.mxu0 %v4730_v38  ;;  %v4824_v38 = vld [vmem:[%s5517_s5 + $0x54] ss:$8 sps:$4 sm:$0xff]  }
 0x182   :  { %2653 = vmatpush1.bf16.msra.mxu1 %v4733_v39  ;;  %2611 = vmatprep.subr.bf16.mxu0 %v4738_v40  ;;  %v4180_v39 = vcombine.high %v2776_v30, %v2776_v30  ;;  %v3006_v40 = vsel %vm3004_vm2, %v3005_v34, 0  ;;  %v4906_v34 = vld [vmem:[#allocation11 + $0xf4] ss:$8 sps:$4 sm:$0xff]  }
 0x183   :  { %2654 = vmatprep.subr.bf16.mxu1 %v4741_v41  ;;  %v4819_v41 = vld [vmem:[#allocation7 + $0xa00] ss:$8 sps:$4 sm:$0xff]  }
 0x185   :  { %2612 = vmatpush1.bf16.msra.mxu0 %v4736_v42  ;;  %v4822_v42 = vld [vmem:[%s5517_s5 + $0x50] ss:$8 sps:$4 sm:$0xff]  }
 0x186   :  { %2655 = vmatpush1.bf16.msra.mxu1 %v4739_v43  ;;  %2613 = vmatprep.subr.bf16.mxu0 %v4744_v44  ;;  %v4179_v43 = vcombine.low %v2776_v30, %v2776_v30  ;;  %v4828_v44 = vld [vmem:[%s5517_s5 + $0x44] ss:$8 sps:$4 sm:$0xff]  }
 0x187   :  { %2656 = vmatprep.subr.bf16.mxu1 %v4747_v45  ;;  %v3011_v45 = vand.u32 %v4180_v39, %v3006_v40  ;;  %v4898_v30 = vld [vmem:[#allocation11 + $0x10] ss:$8 sps:$4 sm:$0xff]   ;;  %v4931_v39 = vld [vmem:[#allocation13 + $0x60] ss:$8 sps:$4 sm:$0xff]  }
 0x189   :  { %2614 = vmatpush1.bf16.msra.mxu0 %v4742_v46  ;;  %v4825_v46 = vld [vmem:[#allocation2 + $0x50] ss:$84 sps:$4 sm:$0xff]  }
 0x18a   :  { %2657 = vmatpush1.bf16.msra.mxu1 %v4745_v47  ;;  %2615 = vmatprep.subr.bf16.mxu0 %v4750_v48  ;;  %v4826_v47 = vld [vmem:[%s5517_s5 + $0x40] ss:$8 sps:$4 sm:$0xff]   ;;  %v3008_v48 = vand.u32 %v4179_v43, %v3006_v40  ;;  %v4909_v40 = vld [vmem:[#allocation11 + $0xe4] ss:$8 sps:$4 sm:$0xff]   ;;  %v4934_v43 = vld [vmem:[#allocation13 + $0x50] ss:$8 sps:$4 sm:$0xff]  }
 0x18b   :  { %2658 = vmatprep.subr.bf16.mxu1 %v4753_v49  ;;  %v4831_v49 = vld [vmem:[%s5517_s5 + $0x34] ss:$8 sps:$4 sm:$0xff]  }
 0x18d   :  { %2616 = vmatpush1.bf16.msra.mxu0 %v4748_v50  ;;  %v4860_v50 = vld [vmem:[%s5517_s5 + $0x124] ss:$8 sps:$4 sm:$0xff]  }
 0x18e   :  { %2659 = vmatpush1.bf16.msra.mxu1 %v4751_v51  ;;  %2617 = vmatprep.subr.bf16.mxu0 %v4756_v52  ;;  %v4829_v51 = vld [vmem:[%s5517_s5 + $0x30] ss:$8 sps:$4 sm:$0xff]   ;;  %v4858_v52 = vld [vmem:[%s5517_s5 + $0x120] ss:$8 sps:$4 sm:$0xff]  }
 0x18f   :  { %2660 = vmatprep.subr.bf16.mxu1 %v4759_v53  ;;  %v4834_v53 = vld [vmem:[%s5517_s5 + $0x24] ss:$8 sps:$4 sm:$0xff]  }
 0x191   :  { %2618 = vmatpush2.bf16.msra.mxu0 %v4754_v54  ;;  %v4866_v54 = vld [vmem:[%s5517_s5 + $0x114] ss:$8 sps:$4 sm:$0xff]  }
 0x192   :  { %2661 = vmatpush2.bf16.msra.mxu1 %v4757_v55  ;;  %2619 = vmatprep.subr.bf16.mxu0 %v4762_v56  ;;  %v4832_v55 = vld [vmem:[%s5517_s5 + $0x20] ss:$8 sps:$4 sm:$0xff]   ;;  %v4864_v56 = vld [vmem:[%s5517_s5 + $0x110] ss:$8 sps:$4 sm:$0xff]  }
 0x193   :  { %2662 = vmatprep.subr.bf16.mxu1 %v4765_v57  ;;  %v4837_v57 = vld [vmem:[%s5517_s5 + $0x14] ss:$8 sps:$4 sm:$0xff]  }
 0x195   :  { %2620 = vmatpush2.bf16.msra.mxu0 %v4760_v58  ;;  %v4872_v58 = vld [vmem:[%s5517_s5 + $0x104] ss:$8 sps:$4 sm:$0xff]  }
 0x196   :  { %2663 = vmatpush2.bf16.msra.mxu1 %v4763_v59  ;;  %2621 = vmatprep.subr.bf16.mxu0 %v4768_v60  ;;  %v4835_v59 = vld [vmem:[%s5517_s5 + $0x10] ss:$8 sps:$4 sm:$0xff]   ;;  %v4870_v60 = vld [vmem:[%s5517_s5 + $0x100] ss:$8 sps:$4 sm:$0xff]  }
 0x197   :  { %2664 = vmatprep.subr.bf16.mxu1 %v4771_v61  ;;  %v4840_v61 = vld [vmem:[%s5517_s5 + $0x4] ss:$8 sps:$4 sm:$0xff]  }
 0x199   :  { %2622 = vmatpush2.bf16.msra.mxu0 %v4766_v62  ;;  %v4876_v62 = vld [vmem:[#allocation5 + $0x8] ss:$12 sps:$4 sm:$0xff]  }
 0x19a   :  { %2665 = vmatpush2.bf16.msra.mxu1 %v4769_v63  ;;  %2623 = vmatprep.subr.bf16.mxu0 %v4774_v0  ;;  %v4838_v63 = vld [vmem:[%s5517_s5] ss:$8 sps:$4 sm:$0xff]   ;;  %v4843_v0 = vld [vmem:[%s5517_s5 + $0xf4] ss:$8 sps:$4 sm:$0xff]  }
 0x19b   :  { %2666 = vmatprep.subr.bf16.mxu1 %v4777_v1  ;;  %v4841_v1 = vld [vmem:[%s5517_s5 + $0xf0] ss:$8 sps:$4 sm:$0xff]  }
 0x19d   :  { %2624 = vmatpush2.bf16.msra.mxu0 %v4772_v2  ;;  %v4846_v2 = vld [vmem:[%s5517_s5 + $0xe4] ss:$8 sps:$4 sm:$0xff]  }
 0x19e   :  { %2667 = vmatpush2.bf16.msra.mxu1 %v4775_v3  ;;  %2625 = vmatprep.subr.bf16.mxu0 %v4780_v4  ;;  %v4844_v3 = vld [vmem:[%s5517_s5 + $0xe0] ss:$8 sps:$4 sm:$0xff]   ;;  %v4849_v4 = vld [vmem:[%s5517_s5 + $0xd4] ss:$8 sps:$4 sm:$0xff]  }
 0x19f   :  { %2668 = vmatprep.subr.bf16.mxu1 %v4783_v5  ;;  %v4847_v5 = vld [vmem:[%s5517_s5 + $0xd0] ss:$8 sps:$4 sm:$0xff]  }
 0x1a1   :  { %2626 = vmatpush2.bf16.msra.mxu0 %v4778_v6  ;;  %v4852_v6 = vld [vmem:[%s5517_s5 + $0xc4] ss:$8 sps:$4 sm:$0xff]  }
 0x1a2   :  { %2669 = vmatpush2.bf16.msra.mxu1 %v4781_v7  ;;  %2627 = vmatprep.subr.bf16.mxu0 %v4786_v8  ;;  %v4850_v7 = vld [vmem:[%s5517_s5 + $0xc0] ss:$8 sps:$4 sm:$0xff]   ;;  %v4857_v8 = vld [vmem:[%s5517_s5 + $0xb4] ss:$8 sps:$4 sm:$0xff]  }
 0x1a3   :  { %2670 = vmatprep.subr.bf16.mxu1 %v4789_v9  ;;  %v4855_v9 = vld [vmem:[%s5517_s5 + $0xb0] ss:$8 sps:$4 sm:$0xff]  }
 0x1a5   :  { %2628 = vmatpush2.bf16.msra.mxu0 %v4784_v10  ;;  %v4863_v10 = vld [vmem:[%s5517_s5 + $0xa4] ss:$8 sps:$4 sm:$0xff]  }
 0x1a6   :  { %2671 = vmatpush2.bf16.msra.mxu1 %v4787_v11  ;;  %2629 = vmatprep.subr.bf16.mxu0 %v4792_v12  ;;  %v4861_v11 = vld [vmem:[%s5517_s5 + $0xa0] ss:$8 sps:$4 sm:$0xff]   ;;  %v4869_v12 = vld [vmem:[%s5517_s5 + $0x94] ss:$8 sps:$4 sm:$0xff]  }
 0x1a7   :  { %2672 = vmatprep.subr.bf16.mxu1 %v4795_v13  ;;  %v4867_v13 = vld [vmem:[%s5517_s5 + $0x90] ss:$8 sps:$4 sm:$0xff]  }
 0x1a9   :  { %2630 = vmatpush2.bf16.msra.mxu0 %v4790_v14  ;;  %v4875_v14 = vld [vmem:[%s5517_s5 + $0x84] ss:$8 sps:$4 sm:$0xff]  }
 0x1aa   :  { %2673 = vmatpush2.bf16.msra.mxu1 %v4793_v15  ;;  %2631 = vmatprep.subr.bf16.mxu0 %v4798_v16  ;;  %v4873_v15 = vld [vmem:[%s5517_s5 + $0x80] ss:$8 sps:$4 sm:$0xff]  }
 0x1ab   :  { %2674 = vmatprep.subr.bf16.mxu1 %v4801_v17  ;;  %v4882_v16 = vld [vmem:[#allocation11 + $0x74] ss:$8 sps:$4 sm:$0xff]  }
 0x1ac   :  { %v4877_v17 = vld [vmem:[#allocation5] ss:$12 sps:$4 sm:$0xff]  }
 0x1ad   :  { %2632 = vmatpush2.bf16.msra.mxu0 %v4796_v19  ;;  %v4885_v19 = vld [vmem:[#allocation11 + $0x64] ss:$8 sps:$4 sm:$0xff]  }
 0x1ae   :  { %2675 = vmatpush2.bf16.msra.mxu1 %v4799_v20  ;;  %4136 = vmatprep.subr.msk.bf16.mxu0 %vm2250_vm0, %v4135_v21  ;;  %v4883_v20 = vld [vmem:[#allocation11 + $0x60] ss:$8 sps:$4 sm:$0xff]   ;;  %v4888_v21 = vld [vmem:[#allocation11 + $0x54] ss:$8 sps:$4 sm:$0xff]  }
 0x1af   :  { %3013 = vmatprep.subr.bf16.mxu1 %v4811_v22  ;;  %v4886_v22 = vld [vmem:[#allocation11 + $0x50] ss:$8 sps:$4 sm:$0xff]  }
 0x1b0   :  { %2634 = vmatmul.mubr.bf16.vlgmr.msra.gmra.mxu0 %v4802_v24  ;;  %v4889_v24 = vld [vmem:[#allocation11 + $0x40] ss:$8 sps:$4 sm:$0xff]  }
 0x1b1   :  { %2677 = vmatmul.mubr.bf16.vlgmr.msra.gmra.mxu1 %v4805_v25  ;;  %2698 = vmatpush1.bf16.msra.mxu0 %v2252_v27  ;;  %v4894_v25 = vld [vmem:[#allocation11 + $0x34] ss:$8 sps:$4 sm:$0xff]   ;;  %v4897_v27 = vld [vmem:[#allocation11 + $0x24] ss:$8 sps:$4 sm:$0xff]  }
 0x1b2   :  { %3014 = vmatpush1.bf16.msra.mxu1 %v4809_v26  ;;  %2699 = vmatprep.subr.bf16.mxu0 %v4815_v28  ;;  %v4892_v26 = vld [vmem:[#allocation11 + $0x30] ss:$8 sps:$4 sm:$0xff]   ;;  %v4895_v28 = vld [vmem:[#allocation11 + $0x20] ss:$8 sps:$4 sm:$0xff]  }
 0x1b3   :  { %3015 = vmatprep.subr.bf16.mxu1 %v4818_v29  ;;  %2719 = vmatprep.mubr.bf16.mxu0 %v5211_v32  ;;  %v4900_v29 = vld [vmem:[#allocation11 + $0x14] ss:$8 sps:$4 sm:$0xff]  }
 0x1b4   :  { %3045 = vmatprep.mubr.bf16.mxu1 %v4879_v31  ;;  %v4903_v31 = vld [vmem:[#allocation11 + $0x4] ss:$8 sps:$4 sm:$0xff]  }
 0x1b5   :  { %2700 = vmatpush1.bf16.msra.mxu0 %v4813_v35  ;;  %v4928_v35 = vld [vmem:[#allocation13 + $0x70] ss:$8 sps:$4 sm:$0xff]  }
 0x1b6   :  { %3016 = vmatpush1.bf16.msra.mxu1 %v4816_v36  ;;  %2701 = vmatprep.subr.bf16.mxu0 %v4821_v37  ;;  %v4930_v36 = vld [vmem:[#allocation13 + $0x74] ss:$8 sps:$4 sm:$0xff]   ;;  %v4933_v37 = vld [vmem:[#allocation13 + $0x64] ss:$8 sps:$4 sm:$0xff]  }
 0x1b7   :  { %3017 = vmatprep.subr.bf16.mxu1 %v4824_v38  ;;  %v4904_v38 = vld [vmem:[#allocation11 + $0xf0] ss:$8 sps:$4 sm:$0xff]  }
 0x1b9   :  { %2702 = vmatpush1.bf16.msra.mxu0 %v4819_v41  ;;  %v4936_v41 = vld [vmem:[#allocation13 + $0x54] ss:$8 sps:$4 sm:$0xff]  }
 0x1ba   :  { %3018 = vmatpush1.bf16.msra.mxu1 %v4822_v42  ;;  %3064 = vmatprep.subr.bf16.mxu0 %v3011_v45  ;;  %v4907_v42 = vld [vmem:[#allocation11 + $0xe0] ss:$8 sps:$4 sm:$0xff]   ;;  %v4939_v45 = vld [vmem:[#allocation13 + $0x44] ss:$8 sps:$4 sm:$0xff]  }
 0x1bb   :  { %3019 = vmatprep.subr.bf16.mxu1 %v4828_v44  ;;  %v4912_v44 = vld [vmem:[#allocation11 + $0xd4] ss:$8 sps:$4 sm:$0xff]  }
 0x1bc   :  { %4137 = vmatmul.mubr.msk.bf16.vlgmr.msra.gmra.mxu0 %vm2246_vm3, %v4825_v46  ;;  %v4910_v46 = vld [vmem:[#allocation11 + $0xd0] ss:$8 sps:$4 sm:$0xff]  }
 0x1bd   :  { %3065 = vmatpush1.bf16.msra.mxu0 %v3008_v48  ;;  %3088 = vmatprep.mubr.bf16.mxu0 %v5211_v32  ;;  %v4915_v48 = vld [vmem:[#allocation11 + $0xc4] ss:$8 sps:$4 sm:$0xff]  }
 0x1be   :  { %3020 = vmatpush1.bf16.msra.mxu1 %v4826_v47  ;;  %3066 = vmatprep.subr.bf16.mxu0 %v4860_v50  ;;  %v4937_v47 = vld [vmem:[#allocation13 + $0x40] ss:$8 sps:$4 sm:$0xff]  }
 0x1bf   :  { %3021 = vmatprep.subr.bf16.mxu1 %v4831_v49  ;;  %v4942_v49 = vld [vmem:[#allocation13 + $0x34] ss:$8 sps:$4 sm:$0xff]   ;;  %v4913_v50 = vld [vmem:[#allocation11 + $0xc0] ss:$8 sps:$4 sm:$0xff]  }
 0x1c1   :  { %3067 = vmatpush1.bf16.msra.mxu0 %v4858_v52  ;;  %v4918_v52 = vld [vmem:[#allocation11 + $0xb4] ss:$8 sps:$4 sm:$0xff]  }
 0x1c2   :  { %3022 = vmatpush1.bf16.msra.mxu1 %v4829_v51  ;;  %3068 = vmatprep.subr.bf16.mxu0 %v4866_v54  ;;  %v4940_v51 = vld [vmem:[#allocation13 + $0x30] ss:$8 sps:$4 sm:$0xff]  }
 0x1c3   :  { %3023 = vmatprep.subr.bf16.mxu1 %v4834_v53  ;;  %v4945_v53 = vld [vmem:[#allocation13 + $0x24] ss:$8 sps:$4 sm:$0xff]   ;;  %v4916_v54 = vld [vmem:[#allocation11 + $0xb0] ss:$8 sps:$4 sm:$0xff]  }
 0x1c5   :  { %3069 = vmatpush1.bf16.msra.mxu0 %v4864_v56  ;;  %v4921_v56 = vld [vmem:[#allocation11 + $0xa4] ss:$8 sps:$4 sm:$0xff]  }
 0x1c6   :  { %3024 = vmatpush1.bf16.msra.mxu1 %v4832_v55  ;;  %3070 = vmatprep.subr.bf16.mxu0 %v4872_v58  ;;  %v4943_v55 = vld [vmem:[#allocation13 + $0x20] ss:$8 sps:$4 sm:$0xff]  }
 0x1c7   :  { %3025 = vmatprep.subr.bf16.mxu1 %v4837_v57  ;;  %v4948_v57 = vld [vmem:[#allocation13 + $0x14] ss:$8 sps:$4 sm:$0xff]   ;;  %v4919_v58 = vld [vmem:[#allocation11 + $0xa0] ss:$8 sps:$4 sm:$0xff]  }
 0x1c9   :  { %3071 = vmatpush1.bf16.msra.mxu0 %v4870_v60  ;;  %v4924_v60 = vld [vmem:[#allocation11 + $0x94] ss:$8 sps:$4 sm:$0xff]  }
 0x1ca   :  { %3026 = vmatpush1.bf16.msra.mxu1 %v4835_v59  ;;  %3287 = vmatprep.subr.bf16.mxu0 %v4930_v36  ;;  %v4946_v59 = vld [vmem:[#allocation13 + $0x10] ss:$8 sps:$4 sm:$0xff]   ;;  %v504_v36 = vld [vmem:[#allocation8] sm:$0x3] }
 0x1cb   :  { %3027 = vmatprep.subr.bf16.mxu1 %v4840_v61  ;;  %v4951_v61 = vld [vmem:[#allocation13 + $0x4] ss:$8 sps:$4 sm:$0xff]  }
 0x1cc   :  { %4181 = vmatmul.mubr.msk.bf16.vlgmr.msra.gmra.mxu0 %vm2999_vm4, %v4876_v62  ;;  %v4922_v62 = vld [vmem:[#allocation11 + $0x90] ss:$8 sps:$4 sm:$0xff]  }
 0x1cd   :  { %3288 = vmatpush1.bf16.msra.mxu0 %v4928_v35 }
 0x1ce   :  { %3028 = vmatpush1.bf16.msra.mxu1 %v4838_v63  ;;  %3289 = vmatprep.subr.bf16.mxu0 %v4933_v37  ;;  %v4949_v63 = vld [vmem:[#allocation13] ss:$8 sps:$4 sm:$0xff]  }
 0x1cf   :  { %3029 = vmatprep.subr.bf16.mxu1 %v4843_v0  ;;  %v4927_v0 = vld [vmem:[#allocation11 + $0x84] ss:$8 sps:$4 sm:$0xff]  }
 0x1d1   :  { %3290 = vmatpush1.bf16.msra.mxu0 %v4931_v39 }
 0x1d2   :  { %3030 = vmatpush2.bf16.msra.mxu1 %v4841_v1  ;;  %3291 = vmatprep.subr.bf16.mxu0 %v4936_v41  ;;  %v4925_v1 = vld [vmem:[#allocation11 + $0x80] ss:$8 sps:$4 sm:$0xff]  }
 0x1d3   :  { %3031 = vmatprep.subr.bf16.mxu1 %v4846_v2  ;;  %v4954_v2 = vld [vmem:[#allocation13 + $0xb4] ss:$8 sps:$4 sm:$0xff]  }
 0x1d5   :  { %3292 = vmatpush1.bf16.msra.mxu0 %v4934_v43 }
 0x1d6   :  { %3032 = vmatpush2.bf16.msra.mxu1 %v4844_v3  ;;  %3293 = vmatprep.subr.bf16.mxu0 %v4939_v45  ;;  %v4952_v3 = vld [vmem:[#allocation13 + $0xb0] ss:$8 sps:$4 sm:$0xff]  }
 0x1d7   :  { %3033 = vmatprep.subr.bf16.mxu1 %v4849_v4  ;;  %v4957_v4 = vld [vmem:[#allocation13 + $0xa4] ss:$8 sps:$4 sm:$0xff]  }
 0x1d9   :  { %3294 = vmatpush1.bf16.msra.mxu0 %v4937_v47 }
 0x1da   :  { %3034 = vmatpush2.bf16.msra.mxu1 %v4847_v5  ;;  %3295 = vmatprep.subr.bf16.mxu0 %v4942_v49  ;;  %v4955_v5 = vld [vmem:[#allocation13 + $0xa0] ss:$8 sps:$4 sm:$0xff]  }
 0x1db   :  { %3035 = vmatprep.subr.bf16.mxu1 %v4852_v6  ;;  %v4960_v6 = vld [vmem:[#allocation13 + $0x94] ss:$8 sps:$4 sm:$0xff]  }
 0x1dd   :  { %3296 = vmatpush1.bf16.msra.mxu0 %v4940_v51 }
 0x1de   :  { %3036 = vmatpush2.bf16.msra.mxu1 %v4850_v7  ;;  %3297 = vmatprep.subr.bf16.mxu0 %v4945_v53  ;;  %v4958_v7 = vld [vmem:[#allocation13 + $0x90] ss:$8 sps:$4 sm:$0xff]  }
 0x1df   :  { %3037 = vmatprep.subr.bf16.mxu1 %v4857_v8  ;;  %v2291_v8 = vpop.f32.mrf.mxu0 }
 0x1e1   :  { %3298 = vmatpush1.bf16.msra.mxu0 %v4943_v55 }
 0x1e2   :  { %3038 = vmatpush2.bf16.msra.mxu1 %v4855_v9  ;;  %3299 = vmatprep.subr.bf16.mxu0 %v4948_v57  ;;  %v4963_v9 = vld [vmem:[#allocation13 + $0x84] ss:$8 sps:$4 sm:$0xff]  }
 0x1e3   :  { %3039 = vmatprep.subr.bf16.mxu1 %v4863_v10  ;;  %v4961_v10 = vld [vmem:[#allocation13 + $0x80] ss:$8 sps:$4 sm:$0xff]  }
 0x1e5   :  { %3300 = vmatpush1.bf16.msra.mxu0 %v4946_v59 }
 0x1e6   :  { %3040 = vmatpush2.bf16.msra.mxu1 %v4861_v11  ;;  %3301 = vmatprep.subr.bf16.mxu0 %v4951_v61  ;;  %v2334_v11 = vpop.f32.mrf.mxu1 }
 0x1e7   :  { %3041 = vmatprep.subr.bf16.mxu1 %v4869_v12  ;;  %v2293_v12 = vpop.f32.mrf.mxu0 }
 0x1e9   :  { %3302 = vmatpush1.bf16.msra.mxu0 %v4949_v63 }
 0x1ea   :  { %3042 = vmatpush2.bf16.msra.mxu1 %v4867_v13  ;;  %3311 = vmatprep.subr.bf16.mxu0 %v4954_v2  ;;  %v2336_v13 = vpop.f32.mrf.mxu1 }
 0x1eb   :  { %3043 = vmatprep.subr.bf16.mxu1 %v4875_v14  ;;  %v2295_v14 = vpop.f32.mrf.mxu0 }
 0x1ed   :  { %3312 = vmatpush2.bf16.msra.mxu0 %v4952_v3 }
 0x1ee   :  { %3044 = vmatpush2.bf16.msra.mxu1 %v4873_v15  ;;  %3313 = vmatprep.subr.bf16.mxu0 %v4957_v4  ;;  %v2338_v15 = vpop.f32.mrf.mxu1 }
 0x1ef   :  { %3490 = vmatprep.subr.bf16.mxu1 %v4882_v16  ;;  %v2297_v16 = vpop.f32.mrf.mxu0 }
 0x1f1   :  { %3046 = vmatmul.mubr.bf16.vlgmr.msra.gmra.mxu1 %v4877_v17  ;;  %3314 = vmatpush2.bf16.msra.mxu0 %v4955_v5  ;;  %v2377_v17 = vpop.f32.mrf.mxu0 }
 0x1f2   :  { %3491 = vmatpush1.bf16.msra.mxu1 %v4880_v18  ;;  %3315 = vmatprep.subr.bf16.mxu0 %v4960_v6  ;;  %v2340_v18 = vpop.f32.mrf.mxu1 }
 0x1f3   :  { %3492 = vmatprep.subr.bf16.mxu1 %v4885_v19 }
 0x1f4   :  { %v2420_v19 = vpop.f32.mrf.mxu1 }
 0x1f5   :  { %3316 = vmatpush2.bf16.msra.mxu0 %v4958_v7 }
 0x1f6   :  { %3493 = vmatpush1.bf16.msra.mxu1 %v4883_v20  ;;  %3317 = vmatprep.subr.bf16.mxu0 %v4963_v9  ;;  %v2379_v20 = vpop.f32.mrf.mxu0 }
 0x1f7   :  { %3494 = vmatprep.subr.bf16.mxu1 %v4888_v21  ;;  %v2422_v21 = vpop.f32.mrf.mxu1 }
 0x1f9   :  { %3318 = vmatpush2.bf16.msra.mxu0 %v4961_v10 }
 0x1fa   :  { %3495 = vmatpush1.bf16.msra.mxu1 %v4886_v22  ;;  %v2381_v22 = vpop.f32.mrf.mxu0 }
 0x1fb   :  { %3496 = vmatprep.subr.bf16.mxu1 %v4891_v23  ;;  %v2424_v23 = vpop.f32.mrf.mxu1 }
 0x1fe   :  { %3497 = vmatpush1.bf16.msra.mxu1 %v4889_v24  ;;  %v2383_v24 = vpop.f32.mrf.mxu0 }
 0x1ff   :  { %3498 = vmatprep.subr.bf16.mxu1 %v4894_v25  ;;  %v506_v25 = vlaneseq }
 0x202   :  { %3499 = vmatpush1.bf16.msra.mxu1 %v4892_v26  ;;  %v2463_v26 = vpop.f32.mrf.mxu0 }
 0x203   :  { %3500 = vmatprep.subr.bf16.mxu1 %v4897_v27  ;;  %v2426_v27 = vpop.f32.mrf.mxu1 }
 0x206   :  { %3501 = vmatpush1.bf16.msra.mxu1 %v4895_v28  ;;  %v507_v28 = vshrl.u32 %v506_v25, 7 }
 0x207   :  { %3502 = vmatprep.subr.bf16.mxu1 %v4900_v29  ;;  %v2506_v29 = vpop.f32.mrf.mxu1 }
 0x20a   :  { %3503 = vmatpush1.bf16.msra.mxu1 %v4898_v30  ;;  %v2465_v30 = vpop.f32.mrf.mxu0 }
 0x20b   :  { %3504 = vmatprep.subr.bf16.mxu1 %v4903_v31  ;;  %v5437_v31 = vsub.s32 1, %v507_v28 }
 0x20c   :  { %v2467_v35 = vpop.f32.mrf.mxu0 }
 0x20d   :  { %v513_v37 = vrot.slane %v504_v36, %v5437_v31 }
 0x20e   :  { %3505 = vmatpush1.bf16.msra.mxu1 %v4901_v33  ;;  %v5439_v33 = vsub.s32 0, %v507_v28 }
 0x20f   :  { %3506 = vmatprep.subr.bf16.mxu1 %v4906_v34  ;;  %v2508_v34 = vpop.f32.mrf.mxu1 }
 0x211   :  { %v2510_v39 = vpop.f32.mrf.mxu1 }
 0x212   :  { %3507 = vmatpush2.bf16.msra.mxu1 %v4904_v38  ;;  %v509_v38 = vrot.slane %v504_v36, %v5439_v33 }
 0x213   :  { %3508 = vmatprep.subr.bf16.mxu1 %v4909_v40  ;;  %v2469_v40 = vpop.f32.mrf.mxu0  ;;  %v2512_v45 = vpop.f32.mrf.mxu1 }
 0x214   :  { %v2296_v43 = vadd.f32 %v2295_v14, %v509_v38 }
 0x216   :  { %3509 = vmatpush2.bf16.msra.mxu1 %v4907_v42  ;;  %v2294_v42 = vadd.f32 %v2293_v12, %v513_v37 }
 0x217   :  { %3510 = vmatprep.subr.bf16.mxu1 %v4912_v44  ;;  %v2292_v44 = vadd.f32 %v2291_v8, %v509_v38 }
 0x218   :  { %v2337_v49 = vadd.f32 %v2336_v13, %v2294_v42 }
 0x219   :  { %v2335_v51 = vadd.f32 %v2334_v11, %v2292_v44 }
 0x21a   :  { %3511 = vmatpush2.bf16.msra.mxu1 %v4910_v46  ;;  %v2298_v46 = vadd.f32 %v2297_v16, %v513_v37  ;;  %v2380_v53 = vadd.f32 %v2379_v20, %v2337_v49 }
 0x21b   :  { %3512 = vmatprep.subr.bf16.mxu1 %v4915_v48  ;;  %v2378_v55 = vadd.f32 %v2377_v17, %v2335_v51 }
 0x21c   :  { %v2423_v59 = vadd.f32 %v2422_v21, %v2380_v53  ;;  %v2777_v53 = vld [vmem:[#allocation10] sm:$0x3] }
 0x21d   :  { %v2421_v61 = vadd.f32 %v2420_v19, %v2378_v55 }
 0x21e   :  { %3513 = vmatpush2.bf16.msra.mxu1 %v4913_v50  ;;  %v2339_v50 = vadd.f32 %v2338_v15, %v2296_v43 }
 0x21f   :  { %3514 = vmatprep.subr.bf16.mxu1 %v4918_v52  ;;  %v2341_v52 = vadd.f32 %v2340_v18, %v2298_v46  ;;  %v2464_v3 = vadd.f32 %v2463_v26, %v2421_v61 }
 0x221   :  { %v2507_v10 = vadd.f32 %v2506_v29, %v2464_v3 }
 0x222   :  { %3515 = vmatpush2.bf16.msra.mxu1 %v4916_v54  ;;  %v2382_v54 = vadd.f32 %v2381_v22, %v2339_v50 }
 0x223   :  { %3516 = vmatprep.subr.bf16.mxu1 %v4921_v56 }
 0x226   :  { %3517 = vmatpush2.bf16.msra.mxu1 %v4919_v58  ;;  %v2384_v58 = vadd.f32 %v2383_v24, %v2341_v52 }
 0x227   :  { %3518 = vmatprep.subr.bf16.mxu1 %v4924_v60  ;;  %v2425_v60 = vadd.f32 %v2424_v23, %v2382_v54  ;;  %v2786_v54 = vrot.slane %v2777_v53, %v5437_v31 }
 0x229   :  { %v2468_v2 = vadd.f32 %v2467_v35, %v2425_v60 }
 0x22a   :  { %3519 = vmatpush2.bf16.msra.mxu1 %v4922_v62 }
 0x22b   :  { %3520 = vmatprep.subr.bf16.mxu1 %v4927_v0  ;;  %v2427_v0 = vadd.f32 %v2426_v27, %v2384_v58  ;;  %v2511_v9 = vadd.f32 %v2510_v39, %v2468_v2 }
 0x22d   :  { %v2470_v5 = vadd.f32 %v2469_v40, %v2427_v0 }
 0x22e   :  { %3521 = vmatpush2.bf16.msra.mxu1 %v4925_v1  ;;  %v2466_v1 = vadd.f32 %v2465_v30, %v2423_v59 }
 0x22f   :  { %v2513_v12 = vadd.f32 %v2512_v45, %v2470_v5 }
 0x230   :  { %v2549_v41 = vpop.f32.mrf.mxu0  ;;  %v2509_v8 = vadd.f32 %v2508_v34, %v2466_v1 }
 0x231   :  { %v2592_v47 = vpop.f32.mrf.mxu1  ;;  %v2550_v15 = vadd.f32 %v2549_v41, %v2507_v10 }
 0x232   :  { %v2551_v48 = vpop.f32.mrf.mxu0 }
 0x233   :  { %v2594_v56 = vpop.f32.mrf.mxu1  ;;  %v2552_v13 = vadd.f32 %v2551_v48, %v2509_v8  ;;  %v2593_v21 = vadd.f32 %v2592_v47, %v2550_v15  ;;  %v4966_v15 = vld [vmem:[%s5522_s10 + $0x70] sm:$0xff]  }
 0x234   :  { %v2553_v57 = vpop.f32.mrf.mxu0 }
 0x235   :  { %v2596_v62 = vpop.f32.mrf.mxu1  ;;  %v2554_v14 = vadd.f32 %v2553_v57, %v2511_v9  ;;  %v2595_v19 = vadd.f32 %v2594_v56, %v2552_v13  ;;  %v2782_v56 = vrot.slane %v2777_v53, %v5439_v33  ;;  %v4964_v13 = vld [vmem:[%s5522_s10 + $0x78] sm:$0xff]  }
 0x236   :  { %v2555_v63 = vpop.f32.mrf.mxu0  ;;  %4256 = vmatprep.subr.bf16.mxu0 %v4964_v13 }
 0x237   :  { %v2598_v6 = vpop.f32.mrf.mxu1  ;;  %v2556_v17 = vadd.f32 %v2555_v63, %v2513_v12  ;;  %v2597_v20 = vadd.f32 %v2596_v62, %v2554_v14  ;;  %v4965_v14 = vld [vmem:[%s5522_s10 + $0x38] sm:$0xff]  }
 0x239   :  { %v2599_v23 = vadd.f32 %v2598_v6, %v2556_v17  ;;  %v4968_v17 = vld [vmem:[%s5522_s10 + $0x68] sm:$0xff]  }
 0x270   :  { %v2635_v4 = vpop.f32.mrf.mxu0 }
 0x271   :  { %v2678_v11 = vpop.f32.mrf.mxu1  ;;  %v2636_v27 = vadd.f32 %v2635_v4, %v2593_v21  ;;  %v4972_v21 = vld [vmem:[%s5522_s10 + $0x58] sm:$0xff]  }
 0x272   :  { %v2637_v7 = vpop.f32.mrf.mxu0 }
 0x273   :  { %v2680_v18 = vpop.f32.mrf.mxu1  ;;  %v2638_v24 = vadd.f32 %v2637_v7, %v2595_v19  ;;  %v2679_v37 = vadd.f32 %v2678_v11, %v2636_v27  ;;  %v4970_v19 = vld [vmem:[%s5522_s10 + $0x60] sm:$0xff]   ;;  %v4977_v27 = vld [vmem:[%s5522_s10 + $0x8] sm:$0xff]  }
 0x274   :  { %v2639_v16 = vpop.f32.mrf.mxu0 }
 0x275   :  { %v2640_v26 = vadd.f32 %v2639_v16, %v2597_v20  ;;  %v2682_v28 = vpop.f32.mrf.mxu1  ;;  %v2681_v35 = vadd.f32 %v2680_v18, %v2638_v24  ;;  %v4967_v16 = vld [vmem:[%s5522_s10 + $0x30] sm:$0xff]   ;;  %v4969_v18 = vld [vmem:[%s5522_s10 + $0x28] sm:$0xff]   ;;  %v4971_v20 = vld [vmem:[%s5522_s10 + $0x20] sm:$0xff]  }
 0x276   :  { %v2641_v22 = vpop.f32.mrf.mxu0  ;;  %v4975_v24 = vld [vmem:[%s5522_s10 + $0x10] sm:$0xff]  }
 0x277   :  { %v2642_v34 = vadd.f32 %v2641_v22, %v2599_v23  ;;  %v2683_v36 = vadd.f32 %v2682_v28, %v2640_v26  ;;  %v2684_v38 = vpop.f32.mrf.mxu1  ;;  %v4973_v22 = vld [vmem:[%s5522_s10 + $0x18] sm:$0xff]   ;;  %v4974_v23 = vld [vmem:[%s5522_s10 + $0x50] sm:$0xff]   ;;  %v4976_v26 = vld [vmem:[%s5522_s10 + $0x48] sm:$0xff]  }
 0x278   :  { %v4978_v28 = vld [vmem:[%s5522_s10 + $0x40] sm:$0xff]  }
 0x279   :  { %v2685_v40 = vadd.f32 %v2684_v38, %v2642_v34  ;;  %v3744_v34 = vld [vmem:[%s5514_s2] sm:$0xff] }
 0x27a   :  { %vm3746_vm6 = vcmp.gt.f32.partialorder %v3744_v34, 0.5 }
 0x27b   :  { %vm3749_vm9 = vmxor %vm3746_vm6, %vm5213_vm8 }
 0x27c   :  { %v2721_v30 = vpop.f32.mrf.mxu0 }
 0x27d   :  { %v2722_v43 = vadd.f32 %v2721_v30, %v2679_v37  ;;  %v4979_v30 = vld [vmem:[%s5522_s10] sm:$0xff]  }
 0x27e   :  { %v2723_v29 = vpop.f32.mrf.mxu0 }
 0x27f   :  { %v2724_v41 = vadd.f32 %v2723_v29, %v2681_v35  ;;  %v2730_v49 = vmax.f32 %v2722_v43, 0.0  ;;  %v3745_v29 = vld [vmem:[%s5514_s2 + $0x8] sm:$0xff]  ;;  %v3751_v35 = vsel %vm3749_vm9, 1, %v5211_v32  ;;  %s5214_s2 = smov [#allocation17]  }
 0x280   :  { %v2725_v39 = vpop.f32.mrf.mxu0  ;;  %vm3747_vm7 = vcmp.gt.f32.partialorder %v3745_v29, 0.5  ;;  %3754 = vperm.xlu0 %4297, %v3751_v35   ;;  %s3773_s10 = sshll.u32 %s5214_s2, 4  ;;  %s3774_s10 = int_to_ptr.vmem [resolvable:$true] %s3773_s10 }
 0x281   :  { %v2726_v42 = vadd.f32 %v2725_v39, %v2683_v36  ;;  %v2731_v47 = vmax.f32 %v2724_v41, 0.0  ;;  %vm3750_vm10 = vmxor %vm3747_vm7, %vm5213_vm8  ;;  %s5164_s1 = scalar_lea.vmem %s3774_s10, 256  ;;  %p5169_p4 = scmp.lt.s32.totalorder %s3774_s10, %s3774_s10 }
 0x282   :  { %v2727_v44 = vpop.f32.mrf.mxu0  ;;  %v3752_v36 = vsel %vm3750_vm10, 1, %v5211_v32  ;;  %p5165_p3 = scmp.ne.s32.totalorder %s3774_s10, %s5164_s1  ;;  %p5170_p5 = scmp.lt.s32.totalorder %s5164_s1, %s5164_s1 }
 0x283   :  { %v2728_v45 = vadd.f32 %v2727_v44, %v2685_v40  ;;  %v2732_v46 = vmax.f32 %v2726_v42, 0.0  ;;  %v3533_v40 = vld [vmem:[#allocation14] sm:$0x3] }
 0x284   :  { %3757 = vperm.xlu0 %4297, %v3752_v36   ;;  %v3542_v44 = vrot.slane %v3533_v40, %v5437_v31  ;;  %p5171_p6 = por %p5170_p5, %p5169_p4 }
 0x285   :  { %v2733_v48 = vmax.f32 %v2728_v45, 0.0  ;;  %v3103_v51 = vpack.c.bf16 %v2732_v46, %v2730_v49  ;;  %v3538_v46 = vrot.slane %v3533_v40, %v5439_v33 }
 0x286   :  { %p5172_p7 = pnand %p5171_p6, %p5165_p3 }
 0x287   :  { %v3104_v50 = vpack.c.bf16 %v2733_v48, %v2731_v47 }
 0x289   :  { %3522 = vmatprep.mubr.bf16.mxu1 %v3104_v50 }
 0x28a   :  { %3523 = vmatmul.mubr.bf16.vlgmr.msra.gmra.mxu1 %v3103_v51 }
 0x28c   :  { %v3090_v52 = vpop.f32.mrf.mxu0 }
 0x28e   :  { %v3092_v55 = vpop.f32.mrf.mxu0 }
 0x290   :  { %v3094_v61 = vpop.f32.mrf.mxu0 }
 0x292   :  { %v3096_v5 = vpop.f32.mrf.mxu0 }
 0x2b1   :  { %v3047_v57 = vpop.f32.mrf.mxu1 }
 0x2b2   :  { %v3048_v60 = vadd.f32 %v3047_v57, %v2782_v56 }
 0x2b3   :  { %v3049_v58 = vpop.f32.mrf.mxu1 }
 0x2b4   :  { %v3050_v59 = vadd.f32 %v3049_v58, %v2786_v54  ;;  %v3091_v4 = vadd.f32 %v3090_v52, %v3048_v60 }
 0x2b5   :  { %v3051_v62 = vpop.f32.mrf.mxu1 }
 0x2b6   :  { %v3052_v63 = vadd.f32 %v3051_v62, %v2782_v56  ;;  %v3093_v1 = vadd.f32 %v3092_v55, %v3050_v59  ;;  %v3099_v10 = vmax.f32 %v3091_v4, 0.0 }
 0x2b7   :  { %v3053_v0 = vpop.f32.mrf.mxu1 }
 0x2b8   :  { %v3095_v2 = vadd.f32 %v3094_v61, %v3052_v63  ;;  %v3054_v3 = vadd.f32 %v3053_v0, %v2786_v54  ;;  %v3100_v8 = vmax.f32 %v3093_v1, 0.0  ;;  %v4239_v61 = vld [vmem:[#allocation16] ss:$0 sm:$0xff] }
 0x2ba   :  { %v3097_v6 = vadd.f32 %v3096_v5, %v3054_v3  ;;  %v3101_v7 = vmax.f32 %v3095_v2, 0.0 }
 0x2bc   :  { %v3102_v9 = vmax.f32 %v3097_v6, 0.0  ;;  %v3137_v12 = vpack.c.bf16 %v3101_v7, %v3099_v10  ;;  %v3732_v10 = vand.u32 127, %v506_v25 }
 0x2be   :  { %v3138_v11 = vpack.c.bf16 %v3102_v9, %v3100_v8  ;;  %vm3748_vm11 = vcmp.eq.s32.totalorder %v3732_v10, 3  ;;  %vm3741_vm13 = vcmp.ge.s32.totalorder %v3732_v10, 14 }
 0x2c0   :  { %4206 = vmatprep.mubr.msk.bf16.mxu0 %vm3283_vm5, %v3138_v11 }
 0x2c1   :  { %3320 = vmatmul.mubr.bf16.vlgmr.msra.gmra.mxu0 %v3137_v12 }
 0x2c2   :  { %4257 = vmatpush3.bf16.msra.mxu0 %v4965_v14 }
 0x2c3   :  { %4258 = vmatprep.subr.bf16.mxu0 %v4966_v15 }
 0x2c6   :  { %4259 = vmatpush3.bf16.msra.mxu0 %v4967_v16 }
 0x2c7   :  { %4260 = vmatprep.subr.bf16.mxu0 %v4968_v17 }
 0x2ca   :  { %4261 = vmatpush3.bf16.msra.mxu0 %v4969_v18 }
 0x2cb   :  { %4262 = vmatprep.subr.bf16.mxu0 %v4970_v19 }
 0x2ce   :  { %4263 = vmatpush3.bf16.msra.mxu0 %v4971_v20 }
 0x2cf   :  { %4264 = vmatprep.subr.bf16.mxu0 %v4972_v21 }
 0x2d2   :  { %4265 = vmatpush3.bf16.msra.mxu0 %v4973_v22 }
 0x2d3   :  { %4266 = vmatprep.subr.bf16.mxu0 %v4974_v23 }
 0x2d6   :  { %4267 = vmatpush3.bf16.msra.mxu0 %v4975_v24 }
 0x2d7   :  { %4268 = vmatprep.subr.bf16.mxu0 %v4976_v26 }
 0x2da   :  { %4269 = vmatpush3.bf16.msra.mxu0 %v4977_v27 }
 0x2db   :  { %4270 = vmatprep.subr.bf16.mxu0 %v4978_v28 }
 0x2de   :  { %4271 = vmatpush3.bf16.msra.mxu0 %v4979_v30 }
 0x2fb   :  { %v3755_v11 = vpop.permute.xlu0 %3754 }
 0x2fc   :  { %vm3759_vm12 = vcmp.eq.s32.totalorder %v3755_v11, 1 }
 0x2fd   :  { %vm3761_vm14 = vmand %vm3748_vm11, %vm3759_vm12 }
 0x2ff   :  { %v3758_v12 = vpop.permute.xlu0 %3757 }
 0x300   :  { %vm3760_vm0 = vcmp.eq.s32.totalorder %v3758_v12, 1 }
 0x301   :  { %vm3762_vm1 = vmand %vm3748_vm11, %vm3760_vm0 }
 0x34a   :  { %v3524_v37 = vpop.f32.mrf.mxu1 }
 0x34c   :  { %v3526_v38 = vpop.f32.mrf.mxu1 }
 0x34e   :  { %v3528_v41 = vpop.f32.mrf.mxu1 }
 0x350   :  { %v3530_v49 = vpop.f32.mrf.mxu1 }
 0x381   :  { %v3321_v39 = vpop.f32.mrf.mxu0 }
 0x382   :  { %v3525_v45 = vadd.f32 %v3524_v37, %v3321_v39 }
 0x383   :  { %v3323_v42 = vpop.f32.mrf.mxu0 }
 0x384   :  { %v3527_v43 = vadd.f32 %v3526_v38, %v3323_v42  ;;  %v3545_v53 = vadd.f32 %v3538_v46, %v3525_v45 }
 0x385   :  { %v3325_v47 = vpop.f32.mrf.mxu0 }
 0x386   :  { %v3529_v48 = vadd.f32 %v3528_v41, %v3325_v47  ;;  %v3546_v51 = vadd.f32 %v3542_v44, %v3527_v43  ;;  %v3549_v58 = vmax.f32 %v3545_v53, 0.0 }
 0x387   :  { %v3327_v50 = vpop.f32.mrf.mxu0 }
 0x388   :  { %v3547_v52 = vadd.f32 %v3538_v46, %v3529_v48  ;;  %v3531_v32 = vadd.f32 %v3530_v49, %v3327_v50  ;;  %v3550_v56 = vmax.f32 %v3546_v51, 0.0 }
 0x38a   :  { %v3548_v54 = vadd.f32 %v3542_v44, %v3531_v32  ;;  %v3551_v55 = vmax.f32 %v3547_v52, 0.0 }
 0x38c   :  { %v3552_v57 = vmax.f32 %v3548_v54, 0.0  ;;  %v3553_v60 = vpack.c.bf16 %v3551_v55, %v3549_v58 }
 0x38e   :  { %v3554_v59 = vpack.c.bf16 %v3552_v57, %v3550_v56 }
 0x390   :  { %3722 = vmatprep.mubr.bf16.mxu0 %v3554_v59 }
 0x391   :  { %3723 = vmatmul.mubr.bf16.vlgmr.msra.gmra.mxu0 %v3553_v60 }
 0x451   :  { %v4272_v31 = vpop.f32.mrf.mxu0 }
 0x453   :  { %v4273_v33 = vpop.f32.mrf.mxu0 }
 0x454   :  { %v4274_v62 = vadd.f32 %v4273_v33, %v4272_v31 }
 0x455   :  { %v4275_v63 = vpop.f32.mrf.mxu0 }
 0x456   :  { %v3725_v0 = vadd.f32 %v4274_v62, %v4239_v61 }
 0x457   :  { %v4276_v1 = vpop.f32.mrf.mxu0 }
 0x458   :  { %v3733_v2 = vmax.f32 %v3725_v0, -5.0  ;;  %v4277_v3 = vadd.f32 %v4276_v1, %v4275_v63 }
 0x45a   :  { %v3735_v4 = vmin.f32 %v3733_v2, 2.0  ;;  %v3728_v5 = vadd.f32 %v4277_v3, %v4239_v61 }
 0x45c   :  { %v3737_v6 = vmul.f32 1.442695, %v3735_v4  ;;  %v3734_v7 = vmax.f32 %v3728_v5, -5.0 }
 0x45e   :  { %4980 = vpow2.f32 %v3737_v6  ;;  %v3736_v8 = vmin.f32 %v3734_v7, 2.0 }
 0x460   :  { %v3739_v9 = vmul.f32 1.442695, %v3736_v8 }
 0x462   :  { %4982 = vpow2.f32 %v3739_v9 }
 0x46b   :  { %v4981_v13 = vpop.eup %4980 }
 0x46c   :  { %v3742_v14 = vsel %vm3741_vm13, %v4981_v13, %v3725_v0 }
 0x46d   :  { %v3763_v15 = vsel %vm3761_vm14, -1e+09, %v3742_v14 }
 0x46e   :  { %3766 = vst.msk [vmem:[#allocation17] sm:$0xff] %vm3765_vm15, %v3763_v15 }
 0x46f   :  { %v4983_v16 = vpop.eup %4982 }
 0x470   :  { %v3743_v17 = vsel %vm3741_vm13, %v4983_v16, %v3728_v5 }
 0x471   :  { %v3764_v25 = vsel %vm3762_vm1, -1e+09, %v3743_v17 }
 0x472   :  { %3767 = vst.msk [vmem:[#allocation17 + $0x8] sm:$0xff] %vm3765_vm15, %v3764_v25 }
 0x473   :  { %5175 = shalt.err (!%p5172_p7)
}
 0x474   :  { %3779 = dma.vmem_to_hbm [thread:$0]  %s3774_s10, 256, %s5524_s12, [#allocation4], %s5202_s19, %s5202_s19, %s5203_s20  }
 0x475   :  { %5194 = dma.done.wait [#allocation4], 256  }
 0x476   :  { %5195 = vsyncadd [#allocation4], 4294967040 }
 0x477   :  { %3783 = vsyncpa [#allocation3], 1 }
 0x478   :  { %3784 = vsyncpa [#allocation6], 1 }
 0x479   :  { %3785 = vsyncpa [#allocation9], 1 }
 0x47a   :  { %3786 = vsyncpa [#allocation12], 1 }
 0x47b   :  { %3787 = vsyncpa [#allocation15], 1 }
 0x47c   :  { %3788 = vsyncpa [#allocation4], 1 }

</bundles_post_ra>
